<compile_context>
chip_gen: v5e
topology: v5e:2x2
jax: 0.10.0
libtpu: 0.0.40
codegen_flags: <defaults>
</compile_context>

<pallas_src>
import functools

import jax
import jax.numpy as jnp
from jax.experimental import pallas as pl
from jax.experimental.pallas import tpu as pltpu


# ----------------------------------------------------------------------------
# In-kernel helpers
# ----------------------------------------------------------------------------
def _layernorm(x, gamma, beta, eps=1e-5):
    # nn.LayerNorm(dim): normalize over last axis, eps=1e-5, affine. f32 stats.
    mu = jnp.mean(x, axis=-1, keepdims=True)
    var = jnp.mean(jnp.square(x - mu), axis=-1, keepdims=True)
    return (x - mu) * jax.lax.rsqrt(var + eps) * gamma + beta


def _gelu_erf(x):
    # exact (erf) GELU, matching torch.nn.GELU() default
    return 0.5 * x * (1.0 + jax.lax.erf(x * 0.7071067811865476))


# ----------------------------------------------------------------------------
# Fused per-layer kernel body.  Grid = (batch_tiles, depth); depth is the
# inner, sequential ("arbitrary") axis; the activation (T=BT*N, D) residual
# stream is carried in VMEM f32 scratch across layers.
# ----------------------------------------------------------------------------
def transformer_kernel(
    x_ref,
    ln1_g_ref, ln1_b_ref, wqkv_ref, wo_ref, bo_ref,
    ln2_g_ref, ln2_b_ref, w1_ref, b1_ref, w2_ref, b2_ref,
    o_ref,
    x_scratch,
    *, heads, dim_head,
):
    layer = pl.program_id(1)
    bt, n_tok, d_model = x_ref.shape          # (batch_tile, N, D)
    t = bt * n_tok                            # folded token count
    inner = heads * dim_head

    @pl.when(layer == 0)
    def _():
        x_scratch[...] = x_ref[...].reshape(t, d_model).astype(jnp.float32)

    x = x_scratch[...]                        # (T, D) f32 residual stream

    # ---------------- PreNorm + Attention + residual -------------------------
    xn = _layernorm(x, ln1_g_ref[0], ln1_b_ref[0])                    # (T, D) f32

    # fused, lane-dense QKV projection (scale pre-folded into the q columns)
    qkv = jnp.dot(xn.astype(jnp.bfloat16), wqkv_ref[0],
                  preferred_element_type=jnp.float32)                 # (T, 3*inner)
    qkv3 = qkv.reshape(bt, n_tok, 3 * inner)                          # (BT, N, 3*inner)

    def split_heads(col_off):
        # per-head lane slices -> (H, BT, N, dh) -> (H*BT, N, dh)
        parts = [qkv3[:, :, col_off + h * dim_head: col_off + (h + 1) * dim_head]
                 for h in range(heads)]
        g = jnp.stack(parts, axis=0)
        return g.reshape(heads * bt, n_tok, dim_head)

    q = split_heads(0)
    k = split_heads(inner)
    v = split_heads(2 * inner)

    dots = jnp.einsum('gnd,gmd->gnm',
                      q.astype(jnp.bfloat16), k.astype(jnp.bfloat16),
                      preferred_element_type=jnp.float32)             # (H*BT, N, N)

    m = jnp.max(dots, axis=-1, keepdims=True)
    e = jnp.exp(dots - m)
    s = jnp.sum(e, axis=-1, keepdims=True)
    attn = e * pl.reciprocal(s, approx=True)                          # softmax

    o = jnp.einsum('gnm,gmd->gnd',
                   attn.astype(jnp.bfloat16), v.astype(jnp.bfloat16),
                   preferred_element_type=jnp.float32)                # (H*BT, N, dh)

    # merge heads back onto the lane dim -> single lane-dense output projection
    o4 = o.reshape(heads, bt, n_tok, dim_head)
    o_merged = jnp.concatenate(
        [o4[h].reshape(t, dim_head) for h in range(heads)], axis=-1)  # (T, inner)

    attn_out = jnp.dot(o_merged.astype(jnp.bfloat16), wo_ref[0],
                       preferred_element_type=jnp.float32) + bo_ref[0]
    x = x + attn_out

    # ---------------- PreNorm + FeedForward + residual ------------------------
    xn2 = _layernorm(x, ln2_g_ref[0], ln2_b_ref[0])
    hid = jnp.dot(xn2.astype(jnp.bfloat16), w1_ref[0],
                  preferred_element_type=jnp.float32) + b1_ref[0]     # (T, mlp)
    hid = _gelu_erf(hid)
    y = jnp.dot(hid.astype(jnp.bfloat16), w2_ref[0],                  # bf16 LHS now
                preferred_element_type=jnp.float32) + b2_ref[0]       # (T, D)
    x = x + y

    x_scratch[...] = x

    # NOTE: valid only because depth is the innermost ("arbitrary") grid axis
    # and the output block index is constant over it.
    @pl.when(layer == pl.num_programs(1) - 1)
    def _():
        o_ref[...] = x.reshape(bt, n_tok, d_model).astype(o_ref.dtype)


# ----------------------------------------------------------------------------
# pallas_call wrapper: one call for the whole stack
# ----------------------------------------------------------------------------
def transformer_forward_pallas(x, packed, *, heads, dim_head, batch_tile=None):
    B, N, D = x.shape
    depth = packed["wqkv"].shape[0]
    inner = heads * dim_head
    mlp_dim = packed["w1"].shape[-1]

    if batch_tile is None:
        batch_tile = B                 # default: whole batch per tile -> weights streamed once
    assert B % batch_tile == 0
    assert N % 8 == 0 and D % 128 == 0 and inner % 128 == 0 and mlp_dim % 128 == 0
    num_bt = B // batch_tile

    def per_layer_spec(arr):
        nd = arr.ndim
        return pl.BlockSpec((1,) + arr.shape[1:],
                            lambda b, l, _nd=nd: (l,) + (0,) * (_nd - 1))

    names = ["ln1_g", "ln1_b", "wqkv", "wo", "bo",
             "ln2_g", "ln2_b", "w1", "b1", "w2", "b2"]

    kernel = functools.partial(transformer_kernel, heads=heads, dim_head=dim_head)

    # Advisory cost estimate for XLA's scheduler.
    flops = 2 * B * N * depth * (D * 3 * inner + 2 * N * inner + inner * D + 2 * D * mlp_dim)
    transc = B * depth * (heads * N * N + N * mlp_dim)
    weight_bytes = sum(int(packed[n].size) * jnp.dtype(packed[n].dtype).itemsize
                       for n in names)
    act_bytes = 2 * int(x.size) * jnp.dtype(x.dtype).itemsize
    cost = pl.CostEstimate(flops=flops, transcendentals=transc,
                           bytes_accessed=num_bt * weight_bytes + act_bytes)

    return pl.pallas_call(
        kernel,
        out_shape=jax.ShapeDtypeStruct((B, N, D), x.dtype),
        grid=(num_bt, depth),
        in_specs=[pl.BlockSpec((batch_tile, N, D), lambda b, l: (b, 0, 0))]
        + [per_layer_spec(packed[n]) for n in names],
        out_specs=pl.BlockSpec((batch_tile, N, D), lambda b, l: (b, 0, 0)),
        scratch_shapes=[pltpu.VMEM((batch_tile * N, D), jnp.float32)],
        compiler_params=pltpu.CompilerParams(
            dimension_semantics=("parallel", "arbitrary"),
            vmem_limit_bytes=48 * 1024 * 1024,   # safe on v7x (64 MiB physical)
        ),
        cost_estimate=cost,
    )(x, *[packed[n] for n in names])


# ----------------------------------------------------------------------------
# Parameter init (module layout) + packing into kernel layout
# ----------------------------------------------------------------------------
def init_transformer_params(key, dim, depth, heads, dim_head, mlp_dim):
    inner = heads * dim_head
    layers = []
    for _ in range(depth):
        key, k1, k2, k3, k4 = jax.random.split(key, 5)
        layers.append(dict(
            ln1_g=jnp.ones((dim,), jnp.float32),
            ln1_b=jnp.zeros((dim,), jnp.float32),
            wqkv=(0.02 * jax.random.normal(k1, (dim, 3 * inner))).astype(jnp.float32),
            wo=(0.02 * jax.random.normal(k2, (inner, dim))).astype(jnp.float32),
            bo=jnp.zeros((dim,), jnp.float32),
            ln2_g=jnp.ones((dim,), jnp.float32),
            ln2_b=jnp.zeros((dim,), jnp.float32),
            w1=(0.02 * jax.random.normal(k3, (dim, mlp_dim))).astype(jnp.float32),
            b1=jnp.zeros((mlp_dim,), jnp.float32),
            w2=(0.02 * jax.random.normal(k4, (mlp_dim, dim))).astype(jnp.float32),
            b2=jnp.zeros((dim,), jnp.float32),
        ))
    return layers


def pack_params_for_kernel(layers, heads, dim_head, matmul_dtype=jnp.bfloat16):
    inner = heads * dim_head
    scale = dim_head ** -0.5

    def stack(name):
        return jnp.stack([p[name] for p in layers])

    wqkv = stack("wqkv")                                  # (depth, D, 3*inner)
    wqkv = wqkv.at[:, :, :inner].multiply(scale)          # fold 1/sqrt(dh) into q cols

    return dict(
        ln1_g=stack("ln1_g")[:, None, :], ln1_b=stack("ln1_b")[:, None, :],
        wqkv=wqkv.astype(matmul_dtype),                   # (depth, D, 3*inner)
        wo=stack("wo").astype(matmul_dtype),              # (depth, inner, D)
        bo=stack("bo")[:, None, :],
        ln2_g=stack("ln2_g")[:, None, :], ln2_b=stack("ln2_b")[:, None, :],
        w1=stack("w1").astype(matmul_dtype), b1=stack("b1")[:, None, :],
        w2=stack("w2").astype(matmul_dtype), b2=stack("b2")[:, None, :],
    )


# ----------------------------------------------------------------------------
# Pure-JAX f32 reference mirroring the PyTorch module exactly
# ----------------------------------------------------------------------------
def transformer_reference(x, layers, *, heads, dim_head):
    scale = dim_head ** -0.5
    B, N, D = x.shape
    inner = heads * dim_head
    for p in layers:
        xn = _layernorm(x, p["ln1_g"], p["ln1_b"])
        qkv = xn @ p["wqkv"]
        q, k, v = jnp.split(qkv, 3, axis=-1)
        split = lambda t: t.reshape(B, N, heads, dim_head).transpose(0, 2, 1, 3)
        q, k, v = split(q), split(k), split(v)
        dots = jnp.einsum("bhnd,bhmd->bhnm", q, k) * scale
        attn = jax.nn.softmax(dots, axis=-1)
        o = jnp.einsum("bhnm,bhmd->bhnd", attn, v)
        o = o.transpose(0, 2, 1, 3).reshape(B, N, inner)
        x = x + (o @ p["wo"] + p["bo"])
        xn2 = _layernorm(x, p["ln2_g"], p["ln2_b"])
        h = _gelu_erf(xn2 @ p["w1"] + p["b1"])
        x = x + (h @ p["w2"] + p["b2"])
    return x


if __name__ == "__main__":
    # Small, lane-dense shapes: dim=128, heads=4, dim_head=32 (inner=128),
    # mlp_dim=256, depth=2, batch=2, seq=16.
    dim, depth, heads, dim_head, mlp_dim = 128, 2, 4, 32, 256
    B, N = 2, 16

    key = jax.random.PRNGKey(0)
    kx, kp = jax.random.split(key)
    x = jax.random.normal(kx, (B, N, dim), dtype=jnp.float32)

    layers = init_transformer_params(kp, dim, depth, heads, dim_head, mlp_dim)
    packed = pack_params_for_kernel(layers, heads, dim_head)

    out = transformer_forward_pallas(x, packed, heads=heads, dim_head=dim_head)
    out = jax.block_until_ready(out)

    ref = transformer_reference(x, layers, heads=heads, dim_head=dim_head)
    assert out.shape == (B, N, dim) and out.dtype == jnp.float32
    max_err = float(jnp.max(jnp.abs(out - ref)))
    assert jnp.allclose(out, ref, atol=3e-2, rtol=3e-2), f"max_err={max_err}"
    print("KERNEL_OK")
</pallas_src>

<mosaic_0001>
module attributes {stable_mosaic.version = 11 : i64} {
  func.func @transformer_kernel(%arg0: i32, %arg1: i32, %arg2: memref<2x16x128xf32, #tpu.memory_space<vmem>>, %arg3: memref<1x1x128xf32, #tpu.memory_space<vmem>>, %arg4: memref<1x1x128xf32, #tpu.memory_space<vmem>>, %arg5: memref<1x128x384xbf16, #tpu.memory_space<vmem>>, %arg6: memref<1x128x128xbf16, #tpu.memory_space<vmem>>, %arg7: memref<1x1x128xf32, #tpu.memory_space<vmem>>, %arg8: memref<1x1x128xf32, #tpu.memory_space<vmem>>, %arg9: memref<1x1x128xf32, #tpu.memory_space<vmem>>, %arg10: memref<1x128x256xbf16, #tpu.memory_space<vmem>>, %arg11: memref<1x1x256xf32, #tpu.memory_space<vmem>>, %arg12: memref<1x256x128xbf16, #tpu.memory_space<vmem>>, %arg13: memref<1x1x128xf32, #tpu.memory_space<vmem>>, %arg14: memref<2x16x128xf32, #tpu.memory_space<vmem>>, %arg15: memref<32x128xf32, #tpu.memory_space<vmem>>) attributes {dimension_semantics = [#tpu.dimension_semantics<parallel>, #tpu.dimension_semantics<arbitrary>], iteration_bounds = array<i64: 1, 2>, scalar_prefetch = 0 : i64, scratch_operands = 1 : i64, tpu.core_type = #tpu.core_type<tc>, window_params = [{transform_indices = @transform_0, window_bounds = array<i64: 2, 16, 128>}, {transform_indices = @transform_1, window_bounds = array<i64: 1, 1, 128>}, {transform_indices = @transform_2, window_bounds = array<i64: 1, 1, 128>}, {transform_indices = @transform_3, window_bounds = array<i64: 1, 128, 384>}, {transform_indices = @transform_4, window_bounds = array<i64: 1, 128, 128>}, {transform_indices = @transform_5, window_bounds = array<i64: 1, 1, 128>}, {transform_indices = @transform_6, window_bounds = array<i64: 1, 1, 128>}, {transform_indices = @transform_7, window_bounds = array<i64: 1, 1, 128>}, {transform_indices = @transform_8, window_bounds = array<i64: 1, 128, 256>}, {transform_indices = @transform_9, window_bounds = array<i64: 1, 1, 256>}, {transform_indices = @transform_10, window_bounds = array<i64: 1, 256, 128>}, {transform_indices = @transform_11, window_bounds = array<i64: 1, 1, 128>}, {transform_indices = @transform_12, window_bounds = array<i64: 2, 16, 128>}]} {
    %c0_i32 = arith.constant 0 : i32
    %0 = arith.cmpi eq, %arg1, %c0_i32 : i32
    %1 = arith.extui %0 : i1 to i32
    %c0_i32_0 = arith.constant 0 : i32
    %2 = arith.cmpi ne, %1, %c0_i32_0 : i32
    scf.if %2 {
      %c0_58 = arith.constant 0 : index
      %c0_59 = arith.constant 0 : index
      %c0_60 = arith.constant 0 : index
      %159 = vector.load %arg2[%c0_58, %c0_59, %c0_60] : memref<2x16x128xf32, #tpu.memory_space<vmem>>, vector<2x16x128xf32>
      %160 = vector.shape_cast %159 : vector<2x16x128xf32> to vector<32x128xf32>
      %c0_61 = arith.constant 0 : index
      %c0_62 = arith.constant 0 : index
      %161 = vector.load %arg15[%c0_61, %c0_62] : memref<32x128xf32, #tpu.memory_space<vmem>>, vector<32x128xf32>
      tpu.vector_store %arg15[%c0_61, %c0_62], %160 {strides = array<i32>} : memref<32x128xf32, #tpu.memory_space<vmem>>, vector<32x128xf32>,
    } else {
    }
    %c0 = arith.constant 0 : index
    %c0_1 = arith.constant 0 : index
    %3 = vector.load %arg15[%c0, %c0_1] : memref<32x128xf32, #tpu.memory_space<vmem>>, vector<32x128xf32>
    %c0_2 = arith.constant 0 : index
    %c0_3 = arith.constant 0 : index
    %c0_4 = arith.constant 0 : index
    %4 = vector.load %arg3[%c0_2, %c0_3, %c0_4] : memref<1x1x128xf32, #tpu.memory_space<vmem>>, vector<1x1x128xf32>
    %5 = vector.shape_cast %4 : vector<1x1x128xf32> to vector<1x128xf32>
    %c0_5 = arith.constant 0 : index
    %c0_6 = arith.constant 0 : index
    %c0_7 = arith.constant 0 : index
    %6 = vector.load %arg4[%c0_5, %c0_6, %c0_7] : memref<1x1x128xf32, #tpu.memory_space<vmem>>, vector<1x1x128xf32>
    %7 = vector.shape_cast %6 : vector<1x1x128xf32> to vector<1x128xf32>
    %cst = arith.constant dense<0.000000e+00> : vector<32xf32>
    %8 = vector.multi_reduction <add>, %3, %cst [1] : vector<32x128xf32> to vector<32xf32>
    %9 = vector.shape_cast %8 : vector<32xf32> to vector<32x1xf32>
    %cst_8 = arith.constant 1.280000e+02 : f32
    %10 = vector.broadcast %cst_8 : f32 to vector<32x1xf32>
    %11 = arith.divf %9, %10 : vector<32x1xf32>
    %12 = vector.broadcast %11 : vector<32x1xf32> to vector<32x128xf32>
    %13 = arith.subf %3, %12 : vector<32x128xf32>
    %14 = arith.mulf %13, %13 : vector<32x128xf32>
    %cst_9 = arith.constant dense<0.000000e+00> : vector<32xf32>
    %15 = vector.multi_reduction <add>, %14, %cst_9 [1] : vector<32x128xf32> to vector<32xf32>
    %16 = vector.shape_cast %15 : vector<32xf32> to vector<32x1xf32>
    %cst_10 = arith.constant 1.280000e+02 : f32
    %17 = vector.broadcast %cst_10 : f32 to vector<32x1xf32>
    %18 = arith.divf %16, %17 : vector<32x1xf32>
    %19 = vector.broadcast %11 : vector<32x1xf32> to vector<32x128xf32>
    %20 = arith.subf %3, %19 : vector<32x128xf32>
    %cst_11 = arith.constant 9.99999974E-6 : f32
    %21 = vector.broadcast %cst_11 : f32 to vector<32x1xf32>
    %22 = arith.addf %18, %21 : vector<32x1xf32>
    %23 = math.rsqrt %22 : vector<32x1xf32>
    %24 = vector.broadcast %23 : vector<32x1xf32> to vector<32x128xf32>
    %25 = arith.mulf %20, %24 : vector<32x128xf32>
    %26 = vector.broadcast %5 : vector<1x128xf32> to vector<32x128xf32>
    %27 = arith.mulf %25, %26 : vector<32x128xf32>
    %28 = vector.broadcast %7 : vector<1x128xf32> to vector<32x128xf32>
    %29 = arith.addf %27, %28 : vector<32x128xf32>
    %30 = arith.truncf %29 : vector<32x128xf32> to vector<32x128xbf16>
    %c0_12 = arith.constant 0 : index
    %c0_13 = arith.constant 0 : index
    %c0_14 = arith.constant 0 : index
    %31 = vector.load %arg5[%c0_12, %c0_13, %c0_14] : memref<1x128x384xbf16, #tpu.memory_space<vmem>>, vector<1x128x384xbf16>
    %32 = vector.shape_cast %31 : vector<1x128x384xbf16> to vector<128x384xbf16>
    %cst_15 = arith.constant dense<0.000000e+00> : vector<32x384xf32>
    %33 = tpu.matmul %30, %32, %cst_15 {dimension_numbers = #tpu.dot_dimension_numbers<[1], [0], [0], [1], [0, 0, 1, 1], [], []>} : vector<32x128xbf16>, vector<128x384xbf16>, vector<32x384xf32> -> vector<32x384xf32>
    %34 = vector.shape_cast %33 : vector<32x384xf32> to vector<2x16x384xf32>
    %35 = vector.extract_strided_slice %34 {offsets = [0, 0, 0], sizes = [2, 16, 32], strides = [1, 1, 1]} : vector<2x16x384xf32> to vector<2x16x32xf32>
    %36 = vector.extract_strided_slice %34 {offsets = [0, 0, 32], sizes = [2, 16, 32], strides = [1, 1, 1]} : vector<2x16x384xf32> to vector<2x16x32xf32>
    %37 = vector.extract_strided_slice %34 {offsets = [0, 0, 64], sizes = [2, 16, 32], strides = [1, 1, 1]} : vector<2x16x384xf32> to vector<2x16x32xf32>
    %38 = vector.extract_strided_slice %34 {offsets = [0, 0, 96], sizes = [2, 16, 32], strides = [1, 1, 1]} : vector<2x16x384xf32> to vector<2x16x32xf32>
    %39 = vector.shape_cast %35 : vector<2x16x32xf32> to vector<1x2x16x32xf32>
    %40 = vector.shape_cast %36 : vector<2x16x32xf32> to vector<1x2x16x32xf32>
    %41 = vector.shape_cast %37 : vector<2x16x32xf32> to vector<1x2x16x32xf32>
    %42 = vector.shape_cast %38 : vector<2x16x32xf32> to vector<1x2x16x32xf32>
    %43 = tpu.concatenate %39, %40, %41, %42 in 0 : vector<1x2x16x32xf32>, vector<1x2x16x32xf32>, vector<1x2x16x32xf32>, vector<1x2x16x32xf32> -> vector<4x2x16x32xf32>
    %44 = vector.shape_cast %43 : vector<4x2x16x32xf32> to vector<8x16x32xf32>
    %45 = vector.extract_strided_slice %34 {offsets = [0, 0, 128], sizes = [2, 16, 32], strides = [1, 1, 1]} : vector<2x16x384xf32> to vector<2x16x32xf32>
    %46 = vector.extract_strided_slice %34 {offsets = [0, 0, 160], sizes = [2, 16, 32], strides = [1, 1, 1]} : vector<2x16x384xf32> to vector<2x16x32xf32>
    %47 = vector.extract_strided_slice %34 {offsets = [0, 0, 192], sizes = [2, 16, 32], strides = [1, 1, 1]} : vector<2x16x384xf32> to vector<2x16x32xf32>
    %48 = vector.extract_strided_slice %34 {offsets = [0, 0, 224], sizes = [2, 16, 32], strides = [1, 1, 1]} : vector<2x16x384xf32> to vector<2x16x32xf32>
    %49 = vector.shape_cast %45 : vector<2x16x32xf32> to vector<1x2x16x32xf32>
    %50 = vector.shape_cast %46 : vector<2x16x32xf32> to vector<1x2x16x32xf32>
    %51 = vector.shape_cast %47 : vector<2x16x32xf32> to vector<1x2x16x32xf32>
    %52 = vector.shape_cast %48 : vector<2x16x32xf32> to vector<1x2x16x32xf32>
    %53 = tpu.concatenate %49, %50, %51, %52 in 0 : vector<1x2x16x32xf32>, vector<1x2x16x32xf32>, vector<1x2x16x32xf32>, vector<1x2x16x32xf32> -> vector<4x2x16x32xf32>
    %54 = vector.shape_cast %53 : vector<4x2x16x32xf32> to vector<8x16x32xf32>
    %55 = vector.extract_strided_slice %34 {offsets = [0, 0, 256], sizes = [2, 16, 32], strides = [1, 1, 1]} : vector<2x16x384xf32> to vector<2x16x32xf32>
    %56 = vector.extract_strided_slice %34 {offsets = [0, 0, 288], sizes = [2, 16, 32], strides = [1, 1, 1]} : vector<2x16x384xf32> to vector<2x16x32xf32>
    %57 = vector.extract_strided_slice %34 {offsets = [0, 0, 320], sizes = [2, 16, 32], strides = [1, 1, 1]} : vector<2x16x384xf32> to vector<2x16x32xf32>
    %58 = vector.extract_strided_slice %34 {offsets = [0, 0, 352], sizes = [2, 16, 32], strides = [1, 1, 1]} : vector<2x16x384xf32> to vector<2x16x32xf32>
    %59 = vector.shape_cast %55 : vector<2x16x32xf32> to vector<1x2x16x32xf32>
    %60 = vector.shape_cast %56 : vector<2x16x32xf32> to vector<1x2x16x32xf32>
    %61 = vector.shape_cast %57 : vector<2x16x32xf32> to vector<1x2x16x32xf32>
    %62 = vector.shape_cast %58 : vector<2x16x32xf32> to vector<1x2x16x32xf32>
    %63 = tpu.concatenate %59, %60, %61, %62 in 0 : vector<1x2x16x32xf32>, vector<1x2x16x32xf32>, vector<1x2x16x32xf32>, vector<1x2x16x32xf32> -> vector<4x2x16x32xf32>
    %64 = vector.shape_cast %63 : vector<4x2x16x32xf32> to vector<8x16x32xf32>
    %65 = arith.truncf %44 : vector<8x16x32xf32> to vector<8x16x32xbf16>
    %66 = arith.truncf %54 : vector<8x16x32xf32> to vector<8x16x32xbf16>
    "tpu.trace_start"() <{level = 10 : i32, message = "gnd,gmd->gnm"}> : () -> ()
    %cst_16 = arith.constant dense<0.000000e+00> : vector<8x16x16xf32>
    %67 = tpu.matmul %65, %66, %cst_16 {dimension_numbers = #tpu.dot_dimension_numbers<[2], [2], [1], [1], [0, 0, 0, 1, 1, 1], [0], [0]>} : vector<8x16x32xbf16>, vector<8x16x32xbf16>, vector<8x16x16xf32> -> vector<8x16x16xf32>
    "tpu.trace_stop"() : () -> ()
    %cst_17 = arith.constant dense<0xFF800000> : vector<8x16xf32>
    %68 = vector.multi_reduction <maximumf>, %67, %cst_17 [2] : vector<8x16x16xf32> to vector<8x16xf32>
    %69 = vector.shape_cast %68 : vector<8x16xf32> to vector<8x16x1xf32>
    %70 = vector.broadcast %69 : vector<8x16x1xf32> to vector<8x16x16xf32>
    %71 = arith.subf %67, %70 : vector<8x16x16xf32>
    %72 = math.exp %71 : vector<8x16x16xf32>
    %cst_18 = arith.constant dense<0.000000e+00> : vector<8x16xf32>
    %73 = vector.multi_reduction <add>, %72, %cst_18 [2] : vector<8x16x16xf32> to vector<8x16xf32>
    %74 = vector.shape_cast %73 : vector<8x16xf32> to vector<8x16x1xf32>
    %75 = tpu.reciprocal %74 {approx = true} : vector<8x16x1xf32> -> vector<8x16x1xf32>
    %76 = vector.broadcast %75 : vector<8x16x1xf32> to vector<8x16x16xf32>
    %77 = arith.mulf %72, %76 : vector<8x16x16xf32>
    %78 = arith.truncf %77 : vector<8x16x16xf32> to vector<8x16x16xbf16>
    %79 = arith.truncf %64 : vector<8x16x32xf32> to vector<8x16x32xbf16>
    "tpu.trace_start"() <{level = 10 : i32, message = "gnm,gmd->gnd"}> : () -> ()
    %cst_19 = arith.constant dense<0.000000e+00> : vector<8x16x32xf32>
    %80 = tpu.matmul %78, %79, %cst_19 {dimension_numbers = #tpu.dot_dimension_numbers<[2], [1], [1], [2], [0, 0, 0, 1, 1, 2], [0], [0]>} : vector<8x16x16xbf16>, vector<8x16x32xbf16>, vector<8x16x32xf32> -> vector<8x16x32xf32>
    "tpu.trace_stop"() : () -> ()
    %81 = vector.shape_cast %80 : vector<8x16x32xf32> to vector<4x2x16x32xf32>
    %82 = vector.extract_strided_slice %81 {offsets = [0, 0, 0, 0], sizes = [1, 2, 16, 32], strides = [1, 1, 1, 1]} : vector<4x2x16x32xf32> to vector<1x2x16x32xf32>
    %83 = vector.shape_cast %82 : vector<1x2x16x32xf32> to vector<2x16x32xf32>
    %84 = vector.shape_cast %83 : vector<2x16x32xf32> to vector<32x32xf32>
    %85 = vector.extract_strided_slice %81 {offsets = [1, 0, 0, 0], sizes = [1, 2, 16, 32], strides = [1, 1, 1, 1]} : vector<4x2x16x32xf32> to vector<1x2x16x32xf32>
    %86 = vector.shape_cast %85 : vector<1x2x16x32xf32> to vector<2x16x32xf32>
    %87 = vector.shape_cast %86 : vector<2x16x32xf32> to vector<32x32xf32>
    %88 = vector.extract_strided_slice %81 {offsets = [2, 0, 0, 0], sizes = [1, 2, 16, 32], strides = [1, 1, 1, 1]} : vector<4x2x16x32xf32> to vector<1x2x16x32xf32>
    %89 = vector.shape_cast %88 : vector<1x2x16x32xf32> to vector<2x16x32xf32>
    %90 = vector.shape_cast %89 : vector<2x16x32xf32> to vector<32x32xf32>
    %91 = vector.extract_strided_slice %81 {offsets = [3, 0, 0, 0], sizes = [1, 2, 16, 32], strides = [1, 1, 1, 1]} : vector<4x2x16x32xf32> to vector<1x2x16x32xf32>
    %92 = vector.shape_cast %91 : vector<1x2x16x32xf32> to vector<2x16x32xf32>
    %93 = vector.shape_cast %92 : vector<2x16x32xf32> to vector<32x32xf32>
    %94 = tpu.concatenate %84, %87, %90, %93 in 1 : vector<32x32xf32>, vector<32x32xf32>, vector<32x32xf32>, vector<32x32xf32> -> vector<32x128xf32>
    %95 = arith.truncf %94 : vector<32x128xf32> to vector<32x128xbf16>
    %c0_20 = arith.constant 0 : index
    %c0_21 = arith.constant 0 : index
    %c0_22 = arith.constant 0 : index
    %96 = vector.load %arg6[%c0_20, %c0_21, %c0_22] : memref<1x128x128xbf16, #tpu.memory_space<vmem>>, vector<1x128x128xbf16>
    %97 = vector.shape_cast %96 : vector<1x128x128xbf16> to vector<128x128xbf16>
    %cst_23 = arith.constant dense<0.000000e+00> : vector<32x128xf32>
    %98 = tpu.matmul %95, %97, %cst_23 {dimension_numbers = #tpu.dot_dimension_numbers<[1], [0], [0], [1], [0, 0, 1, 1], [], []>} : vector<32x128xbf16>, vector<128x128xbf16>, vector<32x128xf32> -> vector<32x128xf32>
    %c0_24 = arith.constant 0 : index
    %c0_25 = arith.constant 0 : index
    %c0_26 = arith.constant 0 : index
    %99 = vector.load %arg7[%c0_24, %c0_25, %c0_26] : memref<1x1x128xf32, #tpu.memory_space<vmem>>, vector<1x1x128xf32>
    %100 = vector.shape_cast %99 : vector<1x1x128xf32> to vector<1x128xf32>
    %101 = vector.broadcast %100 : vector<1x128xf32> to vector<32x128xf32>
    %102 = arith.addf %98, %101 : vector<32x128xf32>
    %103 = arith.addf %3, %102 : vector<32x128xf32>
    %c0_27 = arith.constant 0 : index
    %c0_28 = arith.constant 0 : index
    %c0_29 = arith.constant 0 : index
    %104 = vector.load %arg8[%c0_27, %c0_28, %c0_29] : memref<1x1x128xf32, #tpu.memory_space<vmem>>, vector<1x1x128xf32>
    %105 = vector.shape_cast %104 : vector<1x1x128xf32> to vector<1x128xf32>
    %c0_30 = arith.constant 0 : index
    %c0_31 = arith.constant 0 : index
    %c0_32 = arith.constant 0 : index
    %106 = vector.load %arg9[%c0_30, %c0_31, %c0_32] : memref<1x1x128xf32, #tpu.memory_space<vmem>>, vector<1x1x128xf32>
    %107 = vector.shape_cast %106 : vector<1x1x128xf32> to vector<1x128xf32>
    %cst_33 = arith.constant dense<0.000000e+00> : vector<32xf32>
    %108 = vector.multi_reduction <add>, %103, %cst_33 [1] : vector<32x128xf32> to vector<32xf32>
    %109 = vector.shape_cast %108 : vector<32xf32> to vector<32x1xf32>
    %cst_34 = arith.constant 1.280000e+02 : f32
    %110 = vector.broadcast %cst_34 : f32 to vector<32x1xf32>
    %111 = arith.divf %109, %110 : vector<32x1xf32>
    %112 = vector.broadcast %111 : vector<32x1xf32> to vector<32x128xf32>
    %113 = arith.subf %103, %112 : vector<32x128xf32>
    %114 = arith.mulf %113, %113 : vector<32x128xf32>
    %cst_35 = arith.constant dense<0.000000e+00> : vector<32xf32>
    %115 = vector.multi_reduction <add>, %114, %cst_35 [1] : vector<32x128xf32> to vector<32xf32>
    %116 = vector.shape_cast %115 : vector<32xf32> to vector<32x1xf32>
    %cst_36 = arith.constant 1.280000e+02 : f32
    %117 = vector.broadcast %cst_36 : f32 to vector<32x1xf32>
    %118 = arith.divf %116, %117 : vector<32x1xf32>
    %119 = vector.broadcast %111 : vector<32x1xf32> to vector<32x128xf32>
    %120 = arith.subf %103, %119 : vector<32x128xf32>
    %cst_37 = arith.constant 9.99999974E-6 : f32
    %121 = vector.broadcast %cst_37 : f32 to vector<32x1xf32>
    %122 = arith.addf %118, %121 : vector<32x1xf32>
    %123 = math.rsqrt %122 : vector<32x1xf32>
    %124 = vector.broadcast %123 : vector<32x1xf32> to vector<32x128xf32>
    %125 = arith.mulf %120, %124 : vector<32x128xf32>
    %126 = vector.broadcast %105 : vector<1x128xf32> to vector<32x128xf32>
    %127 = arith.mulf %125, %126 : vector<32x128xf32>
    %128 = vector.broadcast %107 : vector<1x128xf32> to vector<32x128xf32>
    %129 = arith.addf %127, %128 : vector<32x128xf32>
    %130 = arith.truncf %129 : vector<32x128xf32> to vector<32x128xbf16>
    %c0_38 = arith.constant 0 : index
    %c0_39 = arith.constant 0 : index
    %c0_40 = arith.constant 0 : index
    %131 = vector.load %arg10[%c0_38, %c0_39, %c0_40] : memref<1x128x256xbf16, #tpu.memory_space<vmem>>, vector<1x128x256xbf16>
    %132 = vector.shape_cast %131 : vector<1x128x256xbf16> to vector<128x256xbf16>
    %cst_41 = arith.constant dense<0.000000e+00> : vector<32x256xf32>
    %133 = tpu.matmul %130, %132, %cst_41 {dimension_numbers = #tpu.dot_dimension_numbers<[1], [0], [0], [1], [0, 0, 1, 1], [], []>} : vector<32x128xbf16>, vector<128x256xbf16>, vector<32x256xf32> -> vector<32x256xf32>
    %c0_42 = arith.constant 0 : index
    %c0_43 = arith.constant 0 : index
    %c0_44 = arith.constant 0 : index
    %134 = vector.load %arg11[%c0_42, %c0_43, %c0_44] : memref<1x1x256xf32, #tpu.memory_space<vmem>>, vector<1x1x256xf32>
    %135 = vector.shape_cast %134 : vector<1x1x256xf32> to vector<1x256xf32>
    %136 = vector.broadcast %135 : vector<1x256xf32> to vector<32x256xf32>
    %137 = arith.addf %133, %136 : vector<32x256xf32>
    %cst_45 = arith.constant 5.000000e-01 : f32
    %138 = vector.broadcast %cst_45 : f32 to vector<32x256xf32>
    %139 = arith.mulf %138, %137 : vector<32x256xf32>
    %cst_46 = arith.constant 0.707106769 : f32
    %140 = vector.broadcast %cst_46 : f32 to vector<32x256xf32>
    %141 = arith.mulf %137, %140 : vector<32x256xf32>
    %142 = math.erf %141 : vector<32x256xf32>
    %cst_47 = arith.constant 1.000000e+00 : f32
    %143 = vector.broadcast %cst_47 : f32 to vector<32x256xf32>
    %144 = arith.addf %143, %142 : vector<32x256xf32>
    %145 = arith.mulf %139, %144 : vector<32x256xf32>
    %146 = arith.truncf %145 : vector<32x256xf32> to vector<32x256xbf16>
    %c0_48 = arith.constant 0 : index
    %c0_49 = arith.constant 0 : index
    %c0_50 = arith.constant 0 : index
    %147 = vector.load %arg12[%c0_48, %c0_49, %c0_50] : memref<1x256x128xbf16, #tpu.memory_space<vmem>>, vector<1x256x128xbf16>
    %148 = vector.shape_cast %147 : vector<1x256x128xbf16> to vector<256x128xbf16>
    %cst_51 = arith.constant dense<0.000000e+00> : vector<32x128xf32>
    %149 = tpu.matmul %146, %148, %cst_51 {dimension_numbers = #tpu.dot_dimension_numbers<[1], [0], [0], [1], [0, 0, 1, 1], [], []>} : vector<32x256xbf16>, vector<256x128xbf16>, vector<32x128xf32> -> vector<32x128xf32>
    %c0_52 = arith.constant 0 : index
    %c0_53 = arith.constant 0 : index
    %c0_54 = arith.constant 0 : index
    %150 = vector.load %arg13[%c0_52, %c0_53, %c0_54] : memref<1x1x128xf32, #tpu.memory_space<vmem>>, vector<1x1x128xf32>
    %151 = vector.shape_cast %150 : vector<1x1x128xf32> to vector<1x128xf32>
    %152 = vector.broadcast %151 : vector<1x128xf32> to vector<32x128xf32>
    %153 = arith.addf %149, %152 : vector<32x128xf32>
    %154 = arith.addf %103, %153 : vector<32x128xf32>
    %c0_55 = arith.constant 0 : index
    %c0_56 = arith.constant 0 : index
    %155 = vector.load %arg15[%c0_55, %c0_56] : memref<32x128xf32, #tpu.memory_space<vmem>>, vector<32x128xf32>
    tpu.vector_store %arg15[%c0_55, %c0_56], %154 {strides = array<i32>} : memref<32x128xf32, #tpu.memory_space<vmem>>, vector<32x128xf32>,
    %c1_i32 = arith.constant 1 : i32
    %156 = arith.cmpi eq, %arg1, %c1_i32 : i32
    %157 = arith.extui %156 : i1 to i32
    %c0_i32_57 = arith.constant 0 : i32
    %158 = arith.cmpi ne, %157, %c0_i32_57 : i32
    scf.if %158 {
      %159 = vector.shape_cast %154 : vector<32x128xf32> to vector<2x16x128xf32>
      %c0_58 = arith.constant 0 : index
      %c0_59 = arith.constant 0 : index
      %c0_60 = arith.constant 0 : index
      %160 = vector.load %arg14[%c0_58, %c0_59, %c0_60] : memref<2x16x128xf32, #tpu.memory_space<vmem>>, vector<2x16x128xf32>
      tpu.vector_store %arg14[%c0_58, %c0_59, %c0_60], %159 {strides = array<i32>} : memref<2x16x128xf32, #tpu.memory_space<vmem>>, vector<2x16x128xf32>,
    } else {
    }
    return
  }
  func.func @transform_0(%arg0: i32, %arg1: i32) -> (i32, i32, i32) {
    %c0_i32 = arith.constant 0 : i32
    %c0_i32_0 = arith.constant 0 : i32
    %c0_i32_1 = arith.constant 0 : i32
    return %arg0, %c0_i32, %c0_i32_0 : i32, i32, i32
  }
  func.func @transform_1(%arg0: i32, %arg1: i32) -> (i32, i32, i32) {
    %c0_i32 = arith.constant 0 : i32
    %c0_i32_0 = arith.constant 0 : i32
    %c0_i32_1 = arith.constant 0 : i32
    return %arg1, %c0_i32, %c0_i32_0 : i32, i32, i32
  }
  func.func @transform_2(%arg0: i32, %arg1: i32) -> (i32, i32, i32) {
    %c0_i32 = arith.constant 0 : i32
    %c0_i32_0 = arith.constant 0 : i32
    %c0_i32_1 = arith.constant 0 : i32
    return %arg1, %c0_i32, %c0_i32_0 : i32, i32, i32
  }
  func.func @transform_3(%arg0: i32, %arg1: i32) -> (i32, i32, i32) {
    %c0_i32 = arith.constant 0 : i32
    %c0_i32_0 = arith.constant 0 : i32
    %c0_i32_1 = arith.constant 0 : i32
    return %arg1, %c0_i32, %c0_i32_0 : i32, i32, i32
  }
  func.func @transform_4(%arg0: i32, %arg1: i32) -> (i32, i32, i32) {
    %c0_i32 = arith.constant 0 : i32
    %c0_i32_0 = arith.constant 0 : i32
    %c0_i32_1 = arith.constant 0 : i32
    return %arg1, %c0_i32, %c0_i32_0 : i32, i32, i32
  }
  func.func @transform_5(%arg0: i32, %arg1: i32) -> (i32, i32, i32) {
    %c0_i32 = arith.constant 0 : i32
    %c0_i32_0 = arith.constant 0 : i32
    %c0_i32_1 = arith.constant 0 : i32
    return %arg1, %c0_i32, %c0_i32_0 : i32, i32, i32
  }
  func.func @transform_6(%arg0: i32, %arg1: i32) -> (i32, i32, i32) {
    %c0_i32 = arith.constant 0 : i32
    %c0_i32_0 = arith.constant 0 : i32
    %c0_i32_1 = arith.constant 0 : i32
    return %arg1, %c0_i32, %c0_i32_0 : i32, i32, i32
  }
  func.func @transform_7(%arg0: i32, %arg1: i32) -> (i32, i32, i32) {
    %c0_i32 = arith.constant 0 : i32
    %c0_i32_0 = arith.constant 0 : i32
    %c0_i32_1 = arith.constant 0 : i32
    return %arg1, %c0_i32, %c0_i32_0 : i32, i32, i32
  }
  func.func @transform_8(%arg0: i32, %arg1: i32) -> (i32, i32, i32) {
    %c0_i32 = arith.constant 0 : i32
    %c0_i32_0 = arith.constant 0 : i32
    %c0_i32_1 = arith.constant 0 : i32
    return %arg1, %c0_i32, %c0_i32_0 : i32, i32, i32
  }
  func.func @transform_9(%arg0: i32, %arg1: i32) -> (i32, i32, i32) {
    %c0_i32 = arith.constant 0 : i32
    %c0_i32_0 = arith.constant 0 : i32
    %c0_i32_1 = arith.constant 0 : i32
    return %arg1, %c0_i32, %c0_i32_0 : i32, i32, i32
  }
  func.func @transform_10(%arg0: i32, %arg1: i32) -> (i32, i32, i32) {
    %c0_i32 = arith.constant 0 : i32
    %c0_i32_0 = arith.constant 0 : i32
    %c0_i32_1 = arith.constant 0 : i32
    return %arg1, %c0_i32, %c0_i32_0 : i32, i32, i32
  }
  func.func @transform_11(%arg0: i32, %arg1: i32) -> (i32, i32, i32) {
    %c0_i32 = arith.constant 0 : i32
    %c0_i32_0 = arith.constant 0 : i32
    %c0_i32_1 = arith.constant 0 : i32
    return %arg1, %c0_i32, %c0_i32_0 : i32, i32, i32
  }
  func.func @transform_12(%arg0: i32, %arg1: i32) -> (i32, i32, i32) {
    %c0_i32 = arith.constant 0 : i32
    %c0_i32_0 = arith.constant 0 : i32
    %c0_i32_1 = arith.constant 0 : i32
    return %arg0, %c0_i32, %c0_i32_0 : i32, i32, i32
  }
}

</mosaic_0001>

<bundles_post_ra>
// kernel: tpu_custom_call.1
= control target key start
LH: loop header
LB: loop body
LE: loop exit
PB: predicated region body
PF: predicated region fallthrough
CT: control target
= control target key end

     0   :  { %s5213_s0 = inlined_call_operand.hbm [shape: f32[2,16,128], index: 0, kind: input, shape index: {}]   ;;  %s5214_s1 = inlined_call_operand.hbm [shape: f32[2,1,128], index: 1, kind: input, shape index: {}]   ;;  %s5215_s2 = inlined_call_operand.hbm [shape: f32[2,1,128], index: 2, kind: input, shape index: {}]   ;;  %s5216_s3 = inlined_call_operand.hbm [shape: bf16[2,128,384], index: 3, kind: input, shape index: {}]   ;;  %s5217_s4 = inlined_call_operand.hbm [shape: bf16[2,128,128], index: 4, kind: input, shape index: {}]   ;;  %s5218_s5 = inlined_call_operand.vmem [shape: f32[2,1,128], index: 5, kind: input, shape index: {}]   ;;  %s5219_s6 = inlined_call_operand.hbm [shape: f32[2,1,128], index: 6, kind: input, shape index: {}]   ;;  %s5220_s7 = inlined_call_operand.hbm [shape: f32[2,1,128], index: 7, kind: input, shape index: {}]   ;;  %s5221_s8 = inlined_call_operand.hbm [shape: bf16[2,128,256], index: 8, kind: input, shape index: {}]   ;;  %s5222_s9 = inlined_call_operand.vmem [shape: f32[2,1,256], index: 9, kind: input, shape index: {}]   ;;  %s5223_s10 = inlined_call_operand.hbm [shape: bf16[2,256,128], index: 10, kind: input, shape index: {}]   ;;  %s5224_s11 = inlined_call_operand.vmem [shape: f32[2,1,128], index: 11, kind: input, shape index: {}]   ;;  %s5225_s12 = inlined_call_operand.hbm [shape: f32[2,16,128], index: 12, kind: output, shape index: {}]  }
   0x1   :  { %5232 = sst [smem:[#allocation28_spill]] %s5213_s0 }
   0x2   :  { %5233 = sst [smem:[#allocation29_spill]] %s5214_s1 }
   0x3   :  { %5234 = sst [smem:[#allocation30_spill]] %s5215_s2 }
   0x4   :  { %5235 = sst [smem:[#allocation31_spill]] %s5216_s3 }
   0x5   :  { %5236 = sst [smem:[#allocation32_spill]] %s5219_s6 }
   0x6   :  { %5237 = sst [smem:[#allocation33_spill]] %s5221_s8 }
   0x7   :  { %5238 = sst [smem:[#allocation34_spill]] %s5222_s9 }
   0x8   :  { %5239 = sst [smem:[#allocation35_spill]] %s5224_s11 }
   0x9   :  { %5240 = sst [smem:[#allocation36_spill]] %s5225_s12 }
   0xa   :  { %17 = vsyncpa [#allocation4], 0 }
   0xb   :  { %18 = vsyncpa [#allocation7], 0 }
   0xc   :  { %20 = vsyncpa [#allocation7 + $0x1], 0 }
   0xd   :  { %21 = vsyncpa [#allocation10], 0 }
   0xe   :  { %23 = vsyncpa [#allocation10 + $0x1], 0 }
   0xf   :  { %24 = vsyncpa [#allocation13], 0 }
  0x10   :  { %26 = vsyncpa [#allocation13 + $0x1], 0 }
  0x11   :  { %27 = vsyncpa [#allocation16], 0 }
  0x12   :  { %29 = vsyncpa [#allocation16 + $0x1], 0 }
  0x13   :  { %30 = vsyncpa [#allocation5], 0  ;;  %s4292_s21 = smov 0   ;;  %s4294_s22 = smov 0  }
  0x14   :  { %s4296_s23 = smov 0   ;;  %s4298_s24 = smov 0  }
  0x15   :  { %s4300_s25 = smov 0   ;;  %s4302_s26 = smov 0  }
  0x16 LB: > { %5241 = sst [smem:[#allocation25_spill]] %s4199_s23  ;;  %s45_s27 = sadd.s32 1, %s4207_s25  ;;  %s4211_s26 = sphi %s4302_s26, %s36_s26   ;;  %s4207_s25 = sphi %s4300_s25, %s5273_s25   ;;  %s4203_s24 = sphi %s4298_s24, %s5272_s24   ;;  %s4199_s23 = sphi %s4296_s23, %s5268_s23   ;;  %s4195_s22 = sphi %s4294_s22, %s5271_s22   ;;  %s4191_s21 = sphi %s4292_s21, %s5270_s21  }
  0x17   : > { %s81_s28 = sadd.s32 1, %s4199_s23  ;;  %p46_p0 = scmp.ge.s32.totalorder %s45_s27, 2 }
  0x18   : > { %p88_p1 = scmp.ne.s32.totalorder %s4199_s23, %s4195_s22  ;;  %p89_p2 = scmp.eq.s32.totalorder %s4211_s26, 0 }
  0x19   : > { %s5275_s27 = smov (%p46_p0, %s45_s27), 0  ;;  %p3549_p4 = scmp.lt.s32.totalorder %s4211_s26, 2 }
  0x1a   : > { %5242 = sst [smem:[#allocation26_spill]] %s5275_s27  ;;  %p4329_p3 = por %p89_p2, %p88_p1 }
  0x1b   : > { %s78_s30 = ssub.s32 %s4207_s25, %s5275_s27  ;;  %s4337_s13 = sand.u32 1, %s4211_s26  }
  0x1c   : > { %p79_p5 = scmp.eq.s32.totalorder %s78_s30, 0  ;;  %s4340_s14 = sand.u32 1, %s4199_s23  }
  0x1d   : > { %s5244_s1 = sld [smem:[#allocation29_spill]]  ;;  %s425_s20 = scalar_lea.vmem [#allocation6], %s4340_s14 }
  0x1e   : > { %s4347_s18 = scalar_select %p79_p5, %s4199_s23, %s81_s28  }
  0x1f   : > { %s432_s27 = sshll.u32 %s425_s20, 4  ;;  %p4352_p6 = pnand %p3549_p4, %p4329_p3  ;;  %s433_s27 = int_to_ptr.vmem [resolvable:$true] %s432_s27 }
  0x20   : > { %5245 = sst [smem:[#allocation27_spill]] %s4347_s18  ;;  %s3492_s15 = smul.u32 192, %s4340_s14 }
  0x21   : > { %s3493_s16 = smul.u32 192, %s4207_s25  ;;  %s5228_s28 = scalar_lea.sflag [#allocation7], %s4337_s13 }
  0x22   : > { %s5247_s3 = sld [smem:[#allocation31_spill]]  ;;  %s460_s18 = scalar_lea.vmem [#allocation9], %s3492_s15 }
  0x23   : > { %s428_s17 = scalar_lea.hbm %s5244_s1, %s4207_s25  ;;  %s468_s23 = sshll.u32 %s460_s18, 4  ;;  %s469_s23 = int_to_ptr.vmem [resolvable:$true] %s468_s23 }
  0x24   : > { %s430_s19 = sshll.u32 %s428_s17, 4  ;;  %s5231_s12 = scalar_lea.sflag [#allocation10], %s4337_s13  ;;  %s431_s19 = int_to_ptr.hbm [resolvable:$true] %s430_s19 }
  0x25   : > { %3526 = dma.hbm_to_vmem [thread:$0]  (!%p4352_p6), %s431_s19, 16, %s433_s27, %s5228_s28  }
  0x26   : > { %s4213_s11 = smov 192   ;;  %s4214_s9 = smov 12  }
  0x27   : > { %s5248_s6 = sld [smem:[#allocation32_spill]]  ;;  %s5229_s18 = scalar_lea.sflag [#allocation13], %s4337_s13 }
  0x28   : > { %s465_s20 = scalar_lea.hbm %s5247_s3, %s3493_s16  ;;  %s509_s16 = scalar_lea.vmem [#allocation12], %s4340_s14 }
  0x29   : > { %s466_s29 = sshll.u32 %s465_s20, 4  ;;  %s516_s17 = sshll.u32 %s509_s16, 4  ;;  %s467_s29 = int_to_ptr.hbm [resolvable:$true] %s466_s29  ;;  %s517_s17 = int_to_ptr.vmem [resolvable:$true] %s516_s17 }
  0x2a   : > { %3532 = dma.hbm_to_vmem [thread:$0]  (!%p4352_p6), %s467_s29, 3072, %s469_s23, %s5231_s12, %s4213_s11, %s4213_s11, %s4214_s9  }
  0x2b   : > { %s3127_s15 = sshll.u32 %s4340_s14, 7  ;;  %s3426_s28 = sshll.u32 %s4207_s25, 7 }
  0x2c   : > { %s5249_s8 = sld [smem:[#allocation33_spill]]  ;;  %s544_s29 = scalar_lea.vmem [#allocation15], %s3127_s15 }
  0x2d   : > { %s512_s1 = scalar_lea.hbm %s5248_s6, %s4207_s25  ;;  %s552_s27 = sshll.u32 %s544_s29, 4  ;;  %s553_s27 = int_to_ptr.vmem [resolvable:$true] %s552_s27 }
  0x2e   : > { %s514_s20 = sshll.u32 %s512_s1, 4  ;;  %s5230_s19 = scalar_lea.sflag [#allocation16], %s4337_s13  ;;  %s515_s20 = int_to_ptr.hbm [resolvable:$true] %s514_s20 }
  0x2f   : > { %3538 = dma.hbm_to_vmem [thread:$0]  (!%p4352_p6), %s515_s20, 16, %s517_s17, %s5229_s18  }
  0x30   : > { %s4215_s1 = smov 128   ;;  %s4216_s16 = smov 8  }
  0x31   : > { %s578_s20 = scalar_lea.hbm %s5223_s10, %s3426_s28  ;;  %s4402_s18 = sadd.s32 4294967295, %s4211_s26  }
  0x32   : > { %s549_s11 = scalar_lea.hbm %s5249_s8, %s3426_s28  ;;  %s579_s9 = sshll.u32 %s578_s20, 4  ;;  %s4397_s9 = int_to_ptr.hbm [resolvable:$true] %s579_s9 }
  0x33   : > { %s550_s23 = sshll.u32 %s549_s11, 4  ;;  %s573_s11 = scalar_lea.vmem [#allocation17], %s3127_s15  ;;  %s551_s23 = int_to_ptr.hbm [resolvable:$true] %s550_s23 }
  0x34   : > { %3544 = dma.hbm_to_vmem [thread:$0]  (!%p4352_p6), %s551_s23, 2048, %s553_s27, %s5230_s19, %s4215_s1, %s4215_s1, %s4216_s16  }
  0x35   : > { %s581_s29 = sshll.u32 %s573_s11, 4  ;;  %p94_p7 = scmp.ne.s32.totalorder %s4195_s22, %s4191_s21  ;;  %s4399_s29 = int_to_ptr.vmem [resolvable:$true] %s581_s29 }
  0x36   : > { %p95_p8 = scmp.eq.s32.totalorder %s4402_s18, 0  ;;  %p3120_p9 = scmp.ge.s32.totalorder %s4211_s26, 1 }
  0x37   : > { %p391_p10 = scmp.lt.s32.totalorder %s4211_s26, 3  ;;  %s5251_s0 = sld [smem:[#allocation28_spill]] }
  0x38   : > { %p4411_p11 = por %p95_p8, %p94_p7  ;;  %s4217_s21 = smov [#allocation3]  }
  0x39   : > { %p4418_p12 = pnand %p3120_p9, %p391_p10  ;;  %s408_s17 = sshll.u32 %s4217_s21, 4  ;;  %s409_s17 = int_to_ptr.vmem [resolvable:$true] %s408_s17 }
  0x3a   : > { %s5253_s2 = sld [smem:[#allocation30_spill]]  ;;  %s442_s19 = scalar_lea.vmem [#allocation8], %s4340_s14 }
  0x3b   : > { %p3519_p13 = pneg %p4418_p12  ;;  %s449_s12 = sshll.u32 %s442_s19, 4  ;;  %s450_s12 = int_to_ptr.vmem [resolvable:$true] %s449_s12 }
  0x3c   : > { %s5254_s21 = scalar_lea.sflag [#allocation7], %s4337_s13  ;;  %s3124_s20 = sshll.u32 %s4340_s14, 6 }
  0x3d   : > { %s406_s27 = sshll.u32 %s5251_s0, 4  ;;  %p3520_p0 = pnand %p3519_p13, %p95_p8  ;;  %s407_s27 = int_to_ptr.hbm [resolvable:$true] %s406_s27 }
  0x3e   : > { %s3425_s11 = sshll.u32 %s4207_s25, 6  ;;  %s482_s6 = scalar_lea.vmem [#allocation11], %s3124_s20 }
  0x3f   : > { %3522 = dma.hbm_to_vmem [thread:$0]  (!%p3520_p0), %s407_s27, 512, %s409_s17, [#allocation4], %s4215_s1, %s4215_s1, %s4216_s16  }
  0x40   : > { %s445_s15 = scalar_lea.hbm %s5253_s2, %s4207_s25  ;;  %s490_s8 = sshll.u32 %s482_s6, 4  ;;  %s491_s8 = int_to_ptr.vmem [resolvable:$true] %s490_s8 }
  0x41   : > { %s447_s23 = sshll.u32 %s445_s15, 4  ;;  %s487_s15 = scalar_lea.hbm %s5217_s4, %s3425_s11  ;;  %s448_s23 = int_to_ptr.hbm [resolvable:$true] %s447_s23 }
  0x42   : > { %3529 = dma.hbm_to_vmem [thread:$0]  (!%p4352_p6), %s448_s23, 16, %s450_s12, %s5254_s21  }
  0x43   : > { %s488_s19 = sshll.u32 %s487_s15, 4  ;;  %s4218_s1 = smov 64   ;;  %s489_s19 = int_to_ptr.hbm [resolvable:$true] %s488_s19 }
  0x44   : > { %s4219_s16 = smov 4   ;;  %s5255_s12 = scalar_lea.sflag [#allocation10], %s4337_s13 }
  0x45   : > { %3535 = dma.hbm_to_vmem [thread:$0]  (!%p4352_p6), %s489_s19, 1024, %s491_s8, %s5255_s12, %s4218_s1, %s4218_s1, %s4219_s16  }
  0x46   : > { %s529_s0 = scalar_lea.hbm %s5220_s7, %s4207_s25  ;;  %s526_s23 = scalar_lea.vmem [#allocation14], %s4340_s14 }
  0x47   : > { %s531_s2 = sshll.u32 %s529_s0, 4  ;;  %s533_s21 = sshll.u32 %s526_s23, 4  ;;  %s532_s2 = int_to_ptr.hbm [resolvable:$true] %s531_s2  ;;  %s534_s21 = int_to_ptr.vmem [resolvable:$true] %s533_s21 }
  0x48   : > { %s5256_s11 = scalar_lea.sflag [#allocation13], %s4337_s13  ;;  %s5257_s6 = scalar_lea.sflag [#allocation16], %s4337_s13 }
  0x49   : > { %3541 = dma.hbm_to_vmem [thread:$0]  (!%p4352_p6), %s532_s2, 16, %s534_s21, %s5256_s11  }
  0x4a   : > { %3547 = dma.hbm_to_vmem [thread:$0]  (!%p4352_p6), %s4397_s9, 2048, %s4399_s29, %s5257_s6, %s4218_s1, %s4218_s1, %s4219_s16  }
  0x4b   : > { %599 = sbr.rel (%p4418_p12) target bundleno = 2190 (0x88e), region = 68 }
  0x50   : > { %4166 = dma.done.wait (%p95_p8), [#allocation4], 512  }
  0x51   : > { %4168 = vsyncadd (%p95_p8), [#allocation4], 4294966784  ;;  %s606_s8 = sand.u32 1, %s4402_s18   ;;  %s4470_s14 = sand.u32 1, %s4195_s22  }
  0x52   : > { %s607_s20 = scalar_lea.sflag [#allocation7], %s606_s8  ;;  %s609_s30 = scalar_lea.vmem [#allocation6], %s4470_s14 }
  0x53   : > { %4170 = dma.done.wait (%p4411_p11), %s607_s20, 32  }
  0x54   : > { %4172 = vsyncadd (%p4411_p11), %s607_s20, 4294967264  ;;  %s3494_s13 = smul.u32 192, %s4470_s14  ;;  %s618_s9 = scalar_lea.vmem [#allocation8], %s4470_s14 }
  0x55   : > { %s625_s29 = scalar_lea.sflag [#allocation10], %s606_s8 }
  0x56   : > { %s4479_s3 = scalar_lea.vmem [#allocation9], %s3494_s13 }
  0x57   : > { %4174 = dma.done.wait (%p4411_p11), %s625_s29, 4096  }
  0x58   : > { %4176 = vsyncadd (%p4411_p11), %s625_s29, 4294963200  ;;  %s3135_s15 = sshll.u32 %s4470_s14, 6  ;;  %s645_s1 = scalar_lea.sflag [#allocation13], %s606_s8 }
  0x59   : > { %s4486_s19 = scalar_lea.vmem [#allocation11], %s3135_s15  ;;  %s647_s16 = scalar_lea.vmem [#allocation12], %s4470_s14 }
  0x5a   : > { %4178 = dma.done.wait (%p4411_p11), %s645_s1, 32  }
  0x5b   : > { %4180 = vsyncadd (%p4411_p11), %s645_s1, 4294967264  ;;  %s3136_s12 = sshll.u32 %s4470_s14, 7  ;;  %s663_s17 = scalar_lea.sflag [#allocation16], %s606_s8 }
  0x5c   : > { %s4495_s0 = scalar_lea.vmem [#allocation15], %s3136_s12 }
  0x5d   : > { %4182 = dma.done.wait (%p4411_p11), %s663_s17, 4096  }
  0x5e   : > { %4184 = vsyncadd (%p4411_p11), %s663_s17, 4294963200  ;;  %p755_p1 = scmp.lt.s32.totalorder %s4203_s24, 1  ;;  %s5258_s13 = sld [smem:[#allocation34_spill]] }
  0x5f   : > { %s5259_s1 = sld [smem:[#allocation35_spill]]  ;;  %s4519_s27 = scalar_lea.vmem [#allocation17], %s3136_s12 }
  0x60   : > { %s4503_s2 = scalar_select %p755_p1, %s4203_s24, 1 }
  0x61   : > { %p3139_p2 = scmp.ne.s32.totalorder %s4203_s24, 0 }
  0x62   : > { %s757_s11 = scalar_lea.vmem %s5218_s5, %s4503_s2  ;;  %s3138_s6 = sshll.u32 %s4503_s2, 1 }
  0x63   : > { %770 = sbr.rel (%p3139_p2) target bundleno = 109 (0x6d), region = 108 }
  0x64   : > { %s4513_s29 = scalar_lea.vmem %s5258_s13, %s3138_s6 }
  0x65   : > { %s764_s17 = scalar_lea.vmem %s5259_s1, %s4503_s2 }
  0x68   : > { %v771_v0 = vld [vmem:[#allocation3] sm:$0xff]  ;;  %v772_v1 = vld [vmem:[#allocation3 + $0x8] sm:$0xff]  ;;  %v773_v2 = vld [vmem:[#allocation3 + $0x10] sm:$0xff] }
  0x69   : > { %775 = vst [vmem:[#allocation2 + $0x10] sm:$0xff] %v771_v0  ;;  %v774_v3 = vld [vmem:[#allocation3 + $0x18] sm:$0xff] }
  0x6a   : > { %776 = vst [vmem:[#allocation2] sm:$0xff] %v772_v1 }
  0x6b   : > { %777 = vst [vmem:[#allocation2 + $0x18] sm:$0xff] %v773_v2 }
  0x6c   : > { %778 = vst [vmem:[#allocation2 + $0x8] sm:$0xff] %v774_v3 }
  0x6d PF: > { %v4220_v8 = vmov 128.0   ;;  %v3226_v31 = vld [vmem:[%s4479_s3 + $0xa8] sm:$0xf]  ;;  %v3450_v32 = vld [vmem:[%s4479_s3 + $0xb0] sm:$0xf0]  ;;  %vm1267_vm13 = vcmask 261120  }
  0x6e   : > { %3741 = vrcp.f32 %v4220_v8  ;;  %v3449_v33 = vld [vmem:[%s4479_s3 + $0xac] sm:$0xf]  ;;  %v3227_v34 = vor.u32 %v3450_v32, %v3226_v31  ;;  %v3228_v35 = vld [vmem:[%s4479_s3 + $0xb4] sm:$0xf0]  ;;  %v3234_v36 = vld [vmem:[%s4479_s3 + $0xb0] sm:$0xf] }
  0x6f   : > { %v3451_v37 = vld [vmem:[%s4479_s3 + $0xb8] sm:$0xf0]  ;;  %v3231_v38 = vor.u32 %v3449_v33, %v3228_v35  ;;  %v3214_v40 = vld [vmem:[%s4479_s3 + $0x90] sm:$0xf]  ;;  %v3446_v42 = vld [vmem:[%s4479_s3 + $0x94] sm:$0xf] }
  0x70   : > { %v779_v5 = vld [vmem:[#allocation2 + $0x10] sm:$0xff]  ;;  %v3235_v39 = vor.u32 %v3451_v37, %v3234_v36  ;;  %1048 = vmatpush.bf16.msra.mxu0 %v3227_v34  ;;  %v3447_v41 = vld [vmem:[%s4479_s3 + $0x98] sm:$0xf0]  ;;  %v3216_v44 = vld [vmem:[%s4479_s3 + $0x9c] sm:$0xf0]  ;;  %vm1498_vm14 = vcmask 130048  }
  0x71   : > { %785 = vadd.xlane.f32.xlu0 %v779_v5  ;;  %v780_v7 = vld [vmem:[#allocation2] sm:$0xff]  ;;  %1067 = vmatpush.bf16.msra.mxu1 %v3231_v38  ;;  %v3215_v43 = vor.u32 %v3447_v41, %v3214_v40  ;;  %v3222_v45 = vld [vmem:[%s4479_s3 + $0x98] sm:$0xf]  ;;  %v3448_v46 = vld [vmem:[%s4479_s3 + $0xa0] sm:$0xf0]  ;;  %v3219_v47 = vor.u32 %v3446_v42, %v3216_v44  ;;  %vm1983_vm15 = vcmask 523264  }
  0x72   : > { %v781_v4 = vld [vmem:[#allocation2 + $0x18] sm:$0xff]  ;;  %1086 = vmatpush.bf16.msra.mxu2 %v3235_v39  ;;  %v3223_v48 = vor.u32 %v3448_v46, %v3222_v45  ;;  %v3444_v50 = vld [vmem:[%s4479_s3 + $0x80] sm:$0xf0]  ;;  %v3443_v51 = vld [vmem:[%s4479_s3 + $0x7c] sm:$0xf]  ;;  %p3420_p3 = scmp.ne.s32.totalorder %s4203_s24, 1 }
  0x73   : > { %789 = vadd.xlane.f32.xlu1 %v781_v4  ;;  %v782_v6 = vld [vmem:[#allocation2 + $0x8] sm:$0xff]  ;;  %v3202_v49 = vld [vmem:[%s4479_s3 + $0x78] sm:$0xf]  ;;  %v3210_v54 = vld [vmem:[%s4479_s3 + $0x80] sm:$0xf] }
  0x74   : > { %v3742_v9 = vpop.eup %3741  ;;  %1049 = vmatpush.bf16.msra.mxu0 %v3215_v43  ;;  %v3203_v52 = vor.u32 %v3444_v50, %v3202_v49  ;;  %v3204_v53 = vld [vmem:[%s4479_s3 + $0x84] sm:$0xf0]  ;;  %v3445_v55 = vld [vmem:[%s4479_s3 + $0x88] sm:$0xf0]  ;;  %v3190_v58 = vld [vmem:[%s4479_s3 + $0x60] sm:$0xf] }
  0x75   : > { %v794_v10 = vmul.f32 128.0, %v3742_v9  ;;  %vm798_vm0 = vweird.f32 %v3742_v9  ;;  %1068 = vmatpush.bf16.msra.mxu1 %v3219_v47  ;;  %v3207_v56 = vor.u32 %v3443_v51, %v3204_v53  ;;  %v3211_v57 = vor.u32 %v3445_v55, %v3210_v54  ;;  %v3441_v59 = vld [vmem:[%s4479_s3 + $0x68] sm:$0xf0]  ;;  %v3440_v60 = vld [vmem:[%s4479_s3 + $0x64] sm:$0xf] }
  0x76   : > { %1087 = vmatpush.bf16.msra.mxu2 %v3223_v48  ;;  %v3191_v61 = vor.u32 %v3441_v59, %v3190_v58  ;;  %v3192_v62 = vld [vmem:[%s4479_s3 + $0x6c] sm:$0xf0]  ;;  %v3198_v63 = vld [vmem:[%s4479_s3 + $0x68] sm:$0xf]  ;;  %v3442_v0 = vld [vmem:[%s4479_s3 + $0x70] sm:$0xf0] }
  0x77   : > { %v795_v11 = vsub.f32 1.0, %v794_v10  ;;  %v3195_v1 = vor.u32 %v3440_v60, %v3192_v62  ;;  %v3199_v2 = vor.u32 %v3442_v0, %v3198_v63  ;;  %v3178_v3 = vld [vmem:[%s4479_s3 + $0x48] sm:$0xf]  ;;  %v3186_v8 = vld [vmem:[%s4479_s3 + $0x50] sm:$0xf] }
  0x78   : > { %1050 = vmatpush.bf16.msra.mxu0 %v3203_v52  ;;  %v3162_v31 = vld [vmem:[%s4479_s3 + $0x20] sm:$0xf]  ;;  %v3433_v32 = vld [vmem:[%s4479_s3 + $0x28] sm:$0xf0]  ;;  %v3428_v38 = vld [vmem:[%s4479_s3 + $0x4] sm:$0xf] }
  0x79   : > { %787 = vadd.xlane.f32.xlu0 %v780_v7  ;;  %v796_v12 = vmul.f32 %v3742_v9, %v795_v11  ;;  %1069 = vmatpush.bf16.msra.mxu1 %v3207_v56  ;;  %v3163_v35 = vor.u32 %v3433_v32, %v3162_v31  ;;  %v3142_v36 = vld [vmem:[%s4479_s3] sm:$0xf]  ;;  %v3429_v37 = vld [vmem:[%s4479_s3 + $0x8] sm:$0xf0]  ;;  %v3144_v42 = vld [vmem:[%s4479_s3 + $0xc] sm:$0xf0] }
  0x7a   : > { %1088 = vmatpush.bf16.msra.mxu2 %v3211_v57  ;;  %v3143_v41 = vor.u32 %v3429_v37, %v3142_v36  ;;  %v3150_v43 = vld [vmem:[%s4479_s3 + $0x8] sm:$0xf]  ;;  %v3430_v44 = vld [vmem:[%s4479_s3 + $0x10] sm:$0xf0]  ;;  %v3147_v45 = vor.u32 %v3428_v38, %v3144_v42 }
  0x7b   : > { %791 = vadd.xlane.f32.xlu1 %v782_v6  ;;  %v797_v13 = vadd.f32 %v3742_v9, %v796_v12  ;;  %v3166_v12 = vld [vmem:[%s4479_s3 + $0x30] sm:$0xf]  ;;  %v3151_v46 = vor.u32 %v3430_v44, %v3150_v43 }
  0x7c   : > { %1051 = vmatpush.bf16.msra.mxu0 %v3191_v61 }
  0x7d   : > { %v4522_v14 = vsel %vm798_vm0, %v3742_v9, %v797_v13  ;;  %1070 = vmatpush.bf16.msra.mxu1 %v3195_v1  ;;  %v3439_v9 = vld [vmem:[%s4479_s3 + $0x58] sm:$0xf0]  ;;  %vm1988_vm0 = vcmask 785408  }
  0x7e   : > { %1089 = vmatpush.bf16.msra.mxu2 %v3199_v2  ;;  %v3187_v11 = vor.u32 %v3439_v9, %v3186_v8  ;;  %v3435_v13 = vld [vmem:[%s4479_s3 + $0x38] sm:$0xf0] }
  0x82   : > { %1090 = vmatpush.bf16.msra.mxu2 %v3187_v11 }
  0xe4   : > { %v786_v16 = vpop.xlane.xlu0 %785 }
  0xe5   : > { %v800_v18 = vmul.f32 %v4522_v14, %v786_v16  ;;  %v3167_v16 = vor.u32 %v3435_v13, %v3166_v12  ;;  %v3735_v12 = vld [vmem:[%s609_s30] ss:$0 sm:$0xff]  ;;  %s4221_s30 = smov 96  }
  0xe6   : > { %v790_v15 = vpop.xlane.xlu1 %789 }
  0xe7   : > { %v802_v17 = vmul.f32 %v4522_v14, %v790_v15  ;;  %v4528_v20 = vsub.f32 %v779_v5, %v800_v18  ;;  %v3437_v5 = vld [vmem:[%s4479_s3 + $0x4c] sm:$0xf]  ;;  %v3434_v15 = vld [vmem:[%s4479_s3 + $0x34] sm:$0xf]  ;;  %v3174_v18 = vld [vmem:[%s4479_s3 + $0x38] sm:$0xf] }
  0xe9   : > { %v4526_v19 = vsub.f32 %v781_v4, %v802_v17  ;;  %v808_v22 = vmul.f32 %v4528_v20, %v4528_v20  ;;  %v3438_v4 = vld [vmem:[%s4479_s3 + $0x50] sm:$0xf0]  ;;  %v3168_v17 = vld [vmem:[%s4479_s3 + $0x3c] sm:$0xf0] }
  0xeb   : > { %v810_v21 = vmul.f32 %v4526_v19, %v4526_v19  ;;  %812 = vadd.xlane.f32.xlu2 %v808_v22  ;;  %v3171_v22 = vor.u32 %v3434_v15, %v3168_v17 }
  0xec   : > { %v788_v24 = vpop.xlane.xlu0 %787 }
  0xed   : > { %816 = vadd.xlane.f32.xlu0 %v810_v21  ;;  %v801_v26 = vmul.f32 %v4522_v14, %v788_v24  ;;  %v3436_v21 = vld [vmem:[%s4479_s3 + $0x40] sm:$0xf0]  ;;  %v3154_v24 = vld [vmem:[%s4479_s3 + $0x18] sm:$0xf] }
  0xee   : > { %v792_v23 = vpop.xlane.xlu1 %791 }
  0xef   : > { %v803_v25 = vmul.f32 %v4522_v14, %v792_v23  ;;  %v4538_v28 = vsub.f32 %v780_v7, %v801_v26  ;;  %v3180_v7 = vld [vmem:[%s4479_s3 + $0x54] sm:$0xf0]  ;;  %v3175_v23 = vor.u32 %v3436_v21, %v3174_v18  ;;  %v3431_v26 = vld [vmem:[%s4479_s3 + $0x1c] sm:$0xf] }
  0xf0   : > { %v3183_v10 = vor.u32 %v3437_v5, %v3180_v7 }
  0xf1   : > { %v4536_v27 = vsub.f32 %v782_v6, %v803_v25  ;;  %v809_v30 = vmul.f32 %v4538_v28, %v4538_v28  ;;  %v3179_v6 = vor.u32 %v3438_v4, %v3178_v3  ;;  %1091 = vmatpush.bf16.msra.mxu2 %v3175_v23  ;;  %v3432_v25 = vld [vmem:[%s4479_s3 + $0x20] sm:$0xf0] }
  0xf2   : > { %1071 = vmatpush.bf16.msra.mxu1 %v3183_v10 }
  0xf3   : > { %v811_v29 = vmul.f32 %v4536_v27, %v4536_v27  ;;  %814 = vadd.xlane.f32.xlu2 %v809_v30  ;;  %1052 = vmatpush.bf16.msra.mxu0 %v3179_v6  ;;  %v3156_v30 = vld [vmem:[%s4479_s3 + $0x24] sm:$0xf0]  ;;  %s4223_s3 = smov 64  }
  0xf4   : > { %v3159_v34 = vor.u32 %v3431_v26, %v3156_v30 }
  0xf5   : > { %818 = vadd.xlane.f32.xlu1 %v811_v29  ;;  %v3155_v29 = vor.u32 %v3432_v25, %v3154_v24  ;;  %1092 = vmatpush.bf16.msra.mxu2 %v3163_v35 }
  0xf6   : > { %1072 = vmatpush.bf16.msra.mxu1 %v3171_v22  ;;  %v3736_v22 = vld [vmem:[%s618_s9] ss:$0 sm:$0xff]  ;;  %s4222_s9 = smov 32  }
  0xf7   : > { %1053 = vmatpush.bf16.msra.mxu0 %v3167_v16 }
  0xf9   : > { %1093 = vmatpush.bf16.msra.mxu2 %v3151_v46 }
  0xfa   : > { %1073 = vmatpush.bf16.msra.mxu1 %v3159_v34 }
  0xfb   : > { %1054 = vmatpush.bf16.msra.mxu0 %v3155_v29 }
  0xfe   : > { %1074 = vmatpush.bf16.msra.mxu1 %v3147_v45 }
  0xff   : > { %1055 = vmatpush.bf16.msra.mxu0 %v3143_v41 }
 0x15e   : > { %v813_v33 = vpop.xlane.xlu2 %812 }
 0x15f   : > { %v820_v39 = vmul.f32 %v813_v33, %v4522_v14 }
 0x160   : > { %v817_v40 = vpop.xlane.xlu0 %816 }
 0x161   : > { %v824_v47 = vadd.f32 1e-05, %v820_v39  ;;  %v822_v48 = vmul.f32 %v817_v40, %v4522_v14 }
 0x163   : > { %3743 = vrsqrt.f32 %v824_v47  ;;  %v826_v49 = vadd.f32 1e-05, %v822_v48  ;;  %vm834_vm2 = vweird.f32 %v824_v47 }
 0x165   : > { %3745 = vrsqrt.f32 %v826_v49  ;;  %vm854_vm9 = vweird.f32 %v826_v49 }
 0x166   : > { %v815_v51 = vpop.xlane.xlu2 %814 }
 0x167   : > { %v821_v53 = vmul.f32 %v815_v51, %v4522_v14 }
 0x168   : > { %v819_v50 = vpop.xlane.xlu1 %818 }
 0x169   : > { %v823_v52 = vmul.f32 %v819_v50, %v4522_v14  ;;  %v3744_v54 = vpop.eup %3743  ;;  %v825_v56 = vadd.f32 1e-05, %v821_v53 }
 0x16a   : > { %v829_v57 = vmul.f32 %v3744_v54, %v824_v47  ;;  %vm835_vm1 = vweird.f32 %v3744_v54 }
 0x16b   : > { %v827_v55 = vadd.f32 1e-05, %v823_v52  ;;  %v3746_v60 = vpop.eup %3745  ;;  %vm836_vm3 = vmor %vm834_vm2, %vm835_vm1  ;;  %vm844_vm5 = vweird.f32 %v825_v56 }
 0x16c   : > { %v830_v58 = vmul.f32 %v3744_v54, %v829_v57  ;;  %v849_v2 = vmul.f32 %v3746_v60, %v826_v49  ;;  %vm855_vm10 = vweird.f32 %v3746_v60 }
 0x16d   : > { %3747 = vrsqrt.f32 %v827_v55  ;;  %vm864_vm7 = vweird.f32 %v827_v55  ;;  %vm856_vm12 = vmor %vm854_vm9, %vm855_vm10 }
 0x16e   : > { %3749 = vrsqrt.f32 %v825_v56  ;;  %v831_v59 = vmul.f32 0.5, %v830_v58  ;;  %v850_v7 = vmul.f32 %v3746_v60, %v849_v2 }
 0x170   : > { %v832_v61 = vsub.f32 1.5, %v831_v59  ;;  %v851_v13 = vmul.f32 0.5, %v850_v7 }
 0x172   : > { %v833_v1 = vmul.f32 %v3744_v54, %v832_v61  ;;  %v852_v23 = vsub.f32 1.5, %v851_v13 }
 0x173   : > { %v3748_v62 = vpop.eup %3747 }
 0x174   : > { %v3750_v63 = vpop.eup %3749  ;;  %v859_v0 = vmul.f32 %v3748_v62, %v827_v55  ;;  %v837_v6 = vsel %vm836_vm3, %v3744_v54, %v833_v1  ;;  %vm865_vm8 = vweird.f32 %v3748_v62  ;;  %v853_v29 = vmul.f32 %v3746_v60, %v852_v23 }
 0x175   : > { %v839_v3 = vmul.f32 %v3750_v63, %v825_v56  ;;  %vm845_vm4 = vweird.f32 %v3750_v63  ;;  %v868_v11 = vmul.f32 %v837_v6, %v4528_v20  ;;  %vm866_vm11 = vmor %vm864_vm7, %vm865_vm8 }
 0x176   : > { %v860_v4 = vmul.f32 %v3748_v62, %v859_v0  ;;  %vm846_vm6 = vmor %vm844_vm5, %vm845_vm4 }
 0x177   : > { %v840_v5 = vmul.f32 %v3750_v63, %v839_v3  ;;  %v875_v21 = vmul.f32 %v3735_v12, %v868_v11 }
 0x178   : > { %v861_v9 = vmul.f32 0.5, %v860_v4 }
 0x179   : > { %v841_v8 = vmul.f32 0.5, %v840_v5  ;;  %v882_v25 = vadd.f32 %v3736_v22, %v875_v21 }
 0x17a   : > { %v862_v16 = vsub.f32 1.5, %v861_v9 }
 0x17b   : > { %v842_v10 = vsub.f32 1.5, %v841_v8 }
 0x17c   : > { %v863_v20 = vmul.f32 %v3748_v62, %v862_v16 }
 0x17d   : > { %v843_v15 = vmul.f32 %v3750_v63, %v842_v10 }
 0x17e   : > { %v867_v31 = vsel %vm866_vm11, %v3748_v62, %v863_v20 }
 0x17f   : > { %v847_v17 = vsel %vm846_vm6, %v3750_v63, %v843_v15  ;;  %v871_v32 = vmul.f32 %v867_v31, %v4536_v27 }
 0x180   : > { %v869_v18 = vmul.f32 %v847_v17, %v4538_v28  ;;  %v857_v28 = vsel %vm856_vm12, %v3746_v60, %v853_v29 }
 0x181   : > { %v870_v33 = vmul.f32 %v857_v28, %v4526_v19  ;;  %v878_v34 = vmul.f32 %v3735_v12, %v871_v32 }
 0x182   : > { %v876_v24 = vmul.f32 %v3735_v12, %v869_v18 }
 0x183   : > { %v877_v35 = vmul.f32 %v3735_v12, %v870_v33  ;;  %v885_v36 = vadd.f32 %v3736_v22, %v878_v34 }
 0x184   : > { %v883_v26 = vadd.f32 %v3736_v22, %v876_v24 }
 0x185   : > { %v884_v37 = vadd.f32 %v3736_v22, %v877_v35 }
 0x186   : > { %v886_v30 = vpack.c.bf16 %v883_v26, %v882_v25 }
 0x187   : > { %v887_v38 = vpack.c.bf16 %v885_v36, %v884_v37 }
 0x188   : > { %1056 = vmatmul.bf16.vlgmr.msra.gmra.mxu0 %v886_v30  ;;  %1075 = vmatmul.bf16.vlgmr.msra.gmra.mxu1 %v886_v30 }
 0x189   : > { %1094 = vmatmul.bf16.vlgmr.msra.gmra.mxu2 %v886_v30 }
 0x198   : > { %1061 = vmatmul.bf16.gmra.mxu0 %v887_v38  ;;  %1080 = vmatmul.bf16.gmra.mxu1 %v887_v38 }
 0x199   : > { %1099 = vmatmul.bf16.gmra.mxu2 %v887_v38 }
 0x205   : > { %v1057_v39 = vpop.f32.mrf.mxu0  ;;  %v1076_v40 = vpop.f32.mrf.mxu1 }
 0x206   : > { %v1241_v42 = vpack.c.bf16 %v1076_v40, %v1076_v40  ;;  %v1225_v51 = vpack.c.bf16 %v1057_v39, %v1057_v39 }
 0x208   : > { %v1264_v19 = vunpack.c.l.b16 %v1241_v42  ;;  %v1259_v61 = vunpack.c.l.b16 %v1225_v51 }
 0x20c   : > { %v1095_v41 = vpop.f32.mrf.mxu2 }
 0x20d   : > { %v1059_v43 = vpop.f32.mrf.mxu0  ;;  %v1078_v44 = vpop.f32.mrf.mxu1  ;;  %v1691_v50 = vpack.c.bf16 %v1095_v41, %v1095_v41 }
 0x20e   : > { %v3615_v45 = vpack.i.bf16 %v1078_v44, %v1076_v40  ;;  %v3620_v46 = vpack.i.bf16 %v1059_v43, %v1057_v39  ;;  %v1242_v47 = vpack.c.bf16 %v1078_v44, %v1078_v44  ;;  %v1226_v48 = vpack.c.bf16 %v1059_v43, %v1059_v43 }
 0x20f   : > { %v1714_v59 = vunpack.c.l.b16 %v1691_v50 }
 0x210   : > { %3616 = vrot.lane.b32.xlu2 %v3615_v45, %s4221_s30  ;;  %3621 = vrot.lane.b32.xlu0 %v3620_v46, %s4221_s30  ;;  %v1265_v27 = vunpack.c.l.b16 %v1242_v47  ;;  %v1260_v58 = vunpack.c.l.b16 %v1226_v48 }
 0x212   : > { %v1266_v49 = vpack.c.b16 %v1265_v27, %v1264_v19  ;;  %v1261_v63 = vpack.c.b16 %v1260_v58, %v1259_v61 }
 0x214   : > { %v1097_v52 = vpop.f32.mrf.mxu2  ;;  %v1272_v53 = vsel %vm1267_vm13, %v1266_v49, 0 }
 0x215   : > { %v1062_v54 = vpop.f32.mrf.mxu0  ;;  %v1081_v55 = vpop.f32.mrf.mxu1  ;;  %1281 = vmatpush.bf16.xpose.msra.mxu3 %v1272_v53  ;;  %v1692_v56 = vpack.c.bf16 %v1097_v52, %v1097_v52  ;;  %v4607_v57 = vpack.i.bf16 %v1097_v52, %v1095_v41 }
 0x216   : > { %v1243_v0 = vpack.c.bf16 %v1081_v55, %v1081_v55  ;;  %v1227_v10 = vpack.c.bf16 %v1062_v54, %v1062_v54 }
 0x217   : > { %v1715_v60 = vunpack.c.l.b16 %v1692_v56 }
 0x218   : > { %3631 = vrot.lane.b32.xlu2 %v3615_v45, %s4222_s9  ;;  %v1295_v6 = vunpack.c.l.b16 %v1243_v0  ;;  %v1290_v13 = vunpack.c.l.b16 %v1227_v10 }
 0x219   : > { %v1716_v62 = vpack.c.b16 %v1715_v60, %v1714_v59 }
 0x21b   : > { %1728 = vmatpush.bf16.msrb.mxu0 %v1716_v62 }
 0x21c   : > { %3236 = vmatmul.msk.bf16.vlgmr.msra.gmra.mxu3 %vm1267_vm13, %v1261_v63  ;;  %v4626_v59 = vpop.f32.mrf.mxu2 }
 0x21d   : > { %v1064_v1 = vpop.f32.mrf.mxu0  ;;  %v1083_v2 = vpop.f32.mrf.mxu1 }
 0x21e   : > { %v3625_v3 = vpack.i.bf16 %v1083_v2, %v1081_v55  ;;  %v3650_v4 = vpack.i.bf16 %v1064_v1, %v1062_v54  ;;  %v1244_v5 = vpack.c.bf16 %v1083_v2, %v1083_v2  ;;  %v1228_v8 = vpack.c.bf16 %v1064_v1, %v1064_v1 }
 0x220   : > { %3636 = vrot.lane.b32.xlu2 %v3620_v46, %s4222_s9  ;;  %3626 = vrot.lane.b32.xlu1 %v3625_v3, %s4221_s30  ;;  %v1296_v7 = vunpack.c.l.b16 %v1244_v5  ;;  %v1291_v12 = vunpack.c.l.b16 %v1228_v8 }
 0x221   : > { %3651 = vrot.lane.b32.xlu0 %v3650_v4, %s4221_s30 }
 0x222   : > { %v1297_v9 = vpack.c.b16 %v1296_v7, %v1295_v6  ;;  %v1292_v15 = vpack.c.b16 %v1291_v12, %v1290_v13 }
 0x224   : > { %v1302_v11 = vsel %vm1267_vm13, %v1297_v9, 0 }
 0x225   : > { %1311 = vmatpush.bf16.xpose.msrb.mxu3 %v1302_v11 }
 0x228   : > { %3646 = vrot.lane.b32.xlu2 %v3620_v46, %s4223_s3  ;;  %3641 = vrot.lane.b32.xlu1 %v3615_v45, %s4223_s3 }
 0x229   : > { %3656 = vrot.lane.b32.xlu0 %v3625_v3, %s4222_s9 }
 0x22c   : > { %3237 = vmatmul.msk.bf16.vlgmr.msrb.gmra.mxu3 %vm1267_vm13, %v1292_v15 }
 0x230   : > { %3671 = vrot.lane.b32.xlu2 %v3650_v4, %s4223_s3  ;;  %3661 = vrot.lane.b32.xlu1 %v3650_v4, %s4222_s9 }
 0x231   : > { %3666 = vrot.lane.b32.xlu0 %v3625_v3, %s4223_s3 }
 0x26a   : > { %v3617_v16 = vpop.permute.xlu2 %3616 }
 0x26b   : > { %v3619_v17 = vunpack.i.h.bf16 %v3617_v16  ;;  %v3618_v18 = vunpack.i.l.bf16 %v3617_v16 }
 0x26d   : > { %v1246_v21 = vpack.c.bf16 %v3619_v17, %v3619_v17  ;;  %v1245_v22 = vpack.c.bf16 %v3618_v18, %v3618_v18 }
 0x26f   : > { %v1326_v23 = vunpack.c.l.b16 %v1246_v21  ;;  %v1325_v24 = vunpack.c.l.b16 %v1245_v22 }
 0x271   : > { %v1327_v20 = vpack.c.b16 %v1326_v23, %v1325_v24 }
 0x272   : > { %v3632_v25 = vpop.permute.xlu2 %3631 }
 0x273   : > { %v3634_v26 = vunpack.i.h.bf16 %v3632_v25  ;;  %v3633_v29 = vunpack.i.l.bf16 %v3632_v25  ;;  %v1332_v30 = vsel %vm1267_vm13, %v1327_v20, 0  ;;  %v4633_v25 = vpop.f32.mrf.mxu2 }
 0x274   : > { %1341 = vmatpush.bf16.xpose.msra.mxu3 %v1332_v30 }
 0x275   : > { %v1254_v31 = vpack.c.bf16 %v3634_v26, %v3634_v26  ;;  %v1253_v28 = vpack.c.bf16 %v3633_v29, %v3633_v29 }
 0x277   : > { %v1446_v32 = vunpack.c.l.b16 %v1254_v31  ;;  %v1445_v33 = vunpack.c.l.b16 %v1253_v28 }
 0x279   : > { %v1447_v34 = vpack.c.b16 %v1446_v32, %v1445_v33 }
 0x27a   : > { %v3637_v35 = vpop.permute.xlu2 %3636 }
 0x27b   : > { %v3639_v36 = vunpack.i.h.bf16 %v3637_v35  ;;  %v3638_v37 = vunpack.i.l.bf16 %v3637_v35  ;;  %v1452_v38 = vsel %vm1267_vm13, %v1447_v34, 0  ;;  %v1694_v35 = vpack.c.bf16 %v4633_v25, %v4633_v25 }
 0x27c   : > { %1461 = vmatpush.bf16.xpose.msrb.mxu2 %v1452_v38 }
 0x27d   : > { %v1238_v39 = vpack.c.bf16 %v3639_v36, %v3639_v36  ;;  %v1237_v40 = vpack.c.bf16 %v3638_v37, %v3638_v37 }
 0x27f   : > { %v1441_v41 = vunpack.c.l.b16 %v1238_v39  ;;  %v1440_v42 = vunpack.c.l.b16 %v1237_v40 }
 0x281   : > { %v1442_v43 = vpack.c.b16 %v1441_v41, %v1440_v42 }
 0x282   : > { %v3622_v44 = vpop.permute.xlu0 %3621  ;;  %v3647_v62 = vpop.permute.xlu2 %3646 }
 0x283   : > { %v3624_v45 = vunpack.i.h.bf16 %v3622_v44  ;;  %v3623_v46 = vunpack.i.l.bf16 %v3622_v44  ;;  %3242 = vmatmul.msk.bf16.vlgmr.msrb.gmra.mxu2 %vm1267_vm13, %v1442_v43  ;;  %v3649_v7 = vunpack.i.h.bf16 %v3647_v62  ;;  %v3648_v8 = vunpack.i.l.bf16 %v3647_v62 }
 0x284   : > { %v1693_v43 = vpack.c.bf16 %v4626_v59, %v4626_v59 }
 0x285   : > { %v1230_v47 = vpack.c.bf16 %v3624_v45, %v3624_v45  ;;  %v1229_v19 = vpack.c.bf16 %v3623_v46, %v3623_v46  ;;  %v1234_v26 = vpack.c.bf16 %v3649_v7, %v3649_v7  ;;  %v1233_v29 = vpack.c.bf16 %v3648_v8, %v3648_v8 }
 0x287   : > { %v1321_v27 = vunpack.c.l.b16 %v1230_v47  ;;  %v1320_v48 = vunpack.c.l.b16 %v1229_v19  ;;  %v1381_v39 = vunpack.c.l.b16 %v1234_v26  ;;  %v1380_v40 = vunpack.c.l.b16 %v1233_v29 }
 0x288   : > { %v1743_v47 = vunpack.c.l.b16 %v1694_v35 }
 0x289   : > { %v1322_v49 = vpack.c.b16 %v1321_v27, %v1320_v48 }
 0x28b   : > { %3238 = vmatmul.msk.bf16.vlgmr.msra.gmra.mxu3 %vm1267_vm13, %v1322_v49  ;;  %v1382_v49 = vpack.c.b16 %v1381_v39, %v1380_v40 }
 0x292   : > { %v3627_v50 = vpop.permute.xlu1 %3626 }
 0x293   : > { %v3629_v51 = vunpack.i.h.bf16 %v3627_v50  ;;  %v3628_v52 = vunpack.i.l.bf16 %v3627_v50  ;;  %v3652_v53 = vpop.permute.xlu0 %3651 }
 0x294   : > { %v3654_v56 = vunpack.i.h.bf16 %v3652_v53  ;;  %v3653_v58 = vunpack.i.l.bf16 %v3652_v53  ;;  %v3672_v53 = vpop.permute.xlu2 %3671 }
 0x295   : > { %v1248_v54 = vpack.c.bf16 %v3629_v51, %v3629_v51  ;;  %v1247_v55 = vpack.c.bf16 %v3628_v52, %v3628_v52  ;;  %v1742_v52 = vunpack.c.l.b16 %v1693_v43 }
 0x296   : > { %v1232_v0 = vpack.c.bf16 %v3654_v56, %v3654_v56  ;;  %v1231_v1 = vpack.c.bf16 %v3653_v58, %v3653_v58  ;;  %v3674_v58 = vunpack.i.h.bf16 %v3672_v53 }
 0x297   : > { %v1356_v60 = vunpack.c.l.b16 %v1248_v54  ;;  %v1355_v61 = vunpack.c.l.b16 %v1247_v55  ;;  %v1744_v56 = vpack.c.b16 %v1743_v47, %v1742_v52 }
 0x298   : > { %v1351_v11 = vunpack.c.l.b16 %v1232_v0  ;;  %v1350_v12 = vunpack.c.l.b16 %v1231_v1  ;;  %v1236_v1 = vpack.c.bf16 %v3674_v58, %v3674_v58 }
 0x299   : > { %v1357_v63 = vpack.c.b16 %v1356_v60, %v1355_v61  ;;  %v3673_v60 = vunpack.i.l.bf16 %v3672_v53 }
 0x29a   : > { %v3642_v2 = vpop.permute.xlu1 %3641  ;;  %v1352_v30 = vpack.c.b16 %v1351_v11, %v1350_v12 }
 0x29b   : > { %v3644_v3 = vunpack.i.h.bf16 %v3642_v2  ;;  %v3643_v4 = vunpack.i.l.bf16 %v3642_v2  ;;  %v3657_v5 = vpop.permute.xlu0 %3656  ;;  %v1362_v6 = vsel %vm1267_vm13, %v1357_v63, 0  ;;  %v1235_v2 = vpack.c.bf16 %v3673_v60, %v3673_v60 }
 0x29c   : > { %v3659_v9 = vunpack.i.h.bf16 %v3657_v5  ;;  %v3658_v10 = vunpack.i.l.bf16 %v3657_v5  ;;  %1371 = vmatpush.bf16.xpose.msrb.mxu3 %v1362_v6 }
 0x29d   : > { %v1250_v13 = vpack.c.bf16 %v3644_v3, %v3644_v3  ;;  %v1249_v15 = vpack.c.bf16 %v3643_v4, %v3643_v4  ;;  %v1411_v4 = vunpack.c.l.b16 %v1236_v1  ;;  %v1410_v5 = vunpack.c.l.b16 %v1235_v2 }
 0x29e   : > { %v1256_v16 = vpack.c.bf16 %v3659_v9, %v3659_v9  ;;  %v1255_v17 = vpack.c.bf16 %v3658_v10, %v3658_v10 }
 0x29f   : > { %v1386_v18 = vunpack.c.l.b16 %v1250_v13  ;;  %v1385_v21 = vunpack.c.l.b16 %v1249_v15  ;;  %v4629_v22 = vpop.f32.mrf.mxu3  ;;  %v1412_v8 = vpack.c.b16 %v1411_v4, %v1410_v5 }
 0x2a0   : > { %v1476_v23 = vunpack.c.l.b16 %v1256_v16  ;;  %v1475_v24 = vunpack.c.l.b16 %v1255_v17  ;;  %v1499_v20 = vsel %vm1498_vm14, %v4629_v22, -inf }
 0x2a1   : > { %1500 = vmax.xlane.f32.xlu2 %v1499_v20  ;;  %v1387_v31 = vpack.c.b16 %v1386_v18, %v1385_v21 }
 0x2a2   : > { %v1477_v28 = vpack.c.b16 %v1476_v23, %v1475_v24  ;;  %v3662_v32 = vpop.permute.xlu1 %3661 }
 0x2a3   : > { %v3667_v33 = vpop.permute.xlu0 %3666  ;;  %3239 = vmatmul.msk.bf16.vlgmr.msrb.gmra.mxu3 %vm1267_vm13, %v1352_v30  ;;  %v1392_v34 = vsel %vm1267_vm13, %v1387_v31, 0  ;;  %v3664_v41 = vunpack.i.h.bf16 %v3662_v32  ;;  %v3663_v42 = vunpack.i.l.bf16 %v3662_v32 }
 0x2a4   : > { %v3669_v36 = vunpack.i.h.bf16 %v3667_v33  ;;  %v3668_v37 = vunpack.i.l.bf16 %v3667_v33  ;;  %1401 = vmatpush.bf16.xpose.msrb.mxu1 %v1392_v34  ;;  %v1482_v38 = vsel %vm1267_vm13, %v1477_v28, 0 }
 0x2a5   : > { %1491 = vmatpush.bf16.xpose.msra.mxu3 %v1482_v38  ;;  %v1240_v50 = vpack.c.bf16 %v3664_v41, %v3664_v41  ;;  %v1239_v51 = vpack.c.bf16 %v3663_v42, %v3663_v42 }
 0x2a6   : > { %v1252_v44 = vpack.c.bf16 %v3669_v36, %v3669_v36  ;;  %v1251_v45 = vpack.c.bf16 %v3668_v37, %v3668_v37 }
 0x2a7   : > { %v4642_v46 = vpop.f32.mrf.mxu3  ;;  %v1471_v61 = vunpack.c.l.b16 %v1240_v50  ;;  %v1470_v62 = vunpack.c.l.b16 %v1239_v51 }
 0x2a8   : > { %v1416_v19 = vunpack.c.l.b16 %v1252_v44  ;;  %v1415_v27 = vunpack.c.l.b16 %v1251_v45  ;;  %v1502_v48 = vsel %vm1498_vm14, %v4642_v46, -inf }
 0x2a9   : > { %1503 = vmax.xlane.f32.xlu1 %v1502_v48  ;;  %v1472_v3 = vpack.c.b16 %v1471_v61, %v1470_v62  ;;  %v4717_v48 = vpack.i.bf16 %v4633_v25, %v4626_v59 }
 0x2aa   : > { %v1417_v54 = vpack.c.b16 %v1416_v19, %v1415_v27 }
 0x2ab   : > { %3240 = vmatmul.msk.bf16.vlgmr.msrb.gmra.mxu1 %vm1267_vm13, %v1382_v49 }
 0x2ac   : > { %v1422_v55 = vsel %vm1267_vm13, %v1417_v54, 0 }
 0x2ad   : > { %1431 = vmatpush.bf16.xpose.msra.mxu1 %v1422_v55 }
 0x2af   : > { %v1313_v63 = vpop.f32.mrf.mxu3 }
 0x2b0   : > { %v1505_v0 = vsel %vm1498_vm14, %v1313_v63, -inf }
 0x2b1   : > { %1506 = vmax.xlane.f32.xlu2 %v1505_v0 }
 0x2b3   : > { %3243 = vmatmul.msk.bf16.vlgmr.msra.gmra.mxu3 %vm1267_vm13, %v1472_v3 }
 0x2b5   : > { %1756 = vmatpush.bf16.msrb.mxu1 %v1744_v56 }
 0x2b7   : > { %v4650_v6 = vpop.f32.mrf.mxu3 }
 0x2b8   : > { %v1508_v7 = vsel %vm1498_vm14, %v4650_v6, -inf }
 0x2b9   : > { %1509 = vmax.xlane.f32.xlu1 %v1508_v7 }
 0x2bb   : > { %3241 = vmatmul.msk.bf16.vlgmr.msra.gmra.mxu1 %vm1267_vm13, %v1412_v8 }
 0x306   : > { %v4659_v11 = vpop.f32.mrf.mxu2 }
 0x307   : > { %v1535_v16 = vsel %vm1498_vm14, %v4659_v11, -inf }
 0x30e   : > { %v4655_v9 = vpop.f32.mrf.mxu3  ;;  %v4682_v28 = vpop.f32.mrf.mxu2 }
 0x30f   : > { %v1511_v10 = vsel %vm1498_vm14, %v4655_v9, -inf  ;;  %v1538_v36 = vsel %vm1498_vm14, %v4682_v28, -inf }
 0x310   : > { %1512 = vmax.xlane.f32.xlu1 %v1511_v10 }
 0x314   : > { %v1501_v12 = vpop.xlane.xlu2 %1500 }
 0x315   : > { %v1547_v13 = vsub.f32 %v4629_v22, %v1501_v12 }
 0x316   : > { %v4672_v24 = vpop.f32.mrf.mxu3 }
 0x317   : > { %v1563_v15 = vmul.f32 1.442695, %v1547_v13  ;;  %v1514_v26 = vsel %vm1498_vm14, %v4672_v24, -inf }
 0x318   : > { %1536 = vmax.xlane.f32.xlu1 %v1535_v16 }
 0x319   : > { %3751 = vpow2.f32 %v1563_v15 }
 0x31c   : > { %v1504_v29 = vpop.xlane.xlu1 %1503 }
 0x31d   : > { %v1548_v32 = vsub.f32 %v4642_v46, %v1504_v29 }
 0x31f   : > { %v4664_v17 = vpop.eup %3751  ;;  %v1565_v37 = vmul.f32 1.442695, %v1548_v32 }
 0x320   : > { %v1595_v18 = vsel %vm1498_vm14, %v4664_v17, 0.0 }
 0x321   : > { %1596 = vadd.xlane.f32.xlu1 %v1595_v18  ;;  %3753 = vpow2.f32 %v1565_v37 }
 0x324   : > { %v1507_v30 = vpop.xlane.xlu2 %1506 }
 0x325   : > { %v1549_v33 = vsub.f32 %v1313_v63, %v1507_v30 }
 0x326   : > { %v4680_v31 = vpop.f32.mrf.mxu3 }
 0x327   : > { %v1567_v38 = vmul.f32 1.442695, %v1549_v33  ;;  %v1517_v42 = vsel %vm1498_vm14, %v4680_v31, -inf  ;;  %v4701_v44 = vpop.eup %3753 }
 0x328   : > { %v4668_v21 = vpop.f32.mrf.mxu1  ;;  %v1598_v47 = vsel %vm1498_vm14, %v4701_v44, 0.0 }
 0x329   : > { %v1523_v23 = vsel %vm1498_vm14, %v4668_v21, -inf  ;;  %3755 = vpow2.f32 %v1567_v38 }
 0x32a   : > { %1524 = vmax.xlane.f32.xlu0 %v1523_v23 }
 0x32c   : > { %v1510_v49 = vpop.xlane.xlu1 %1509 }
 0x32d   : > { %v1550_v50 = vsub.f32 %v4650_v6, %v1510_v49 }
 0x32e   : > { %v4691_v39 = vpop.f32.mrf.mxu3 }
 0x32f   : > { %v1520_v43 = vsel %vm1498_vm14, %v4691_v39, -inf  ;;  %v4703_v45 = vpop.eup %3755  ;;  %v1569_v51 = vmul.f32 1.442695, %v1550_v50 }
 0x330   : > { %v4674_v22 = vpop.f32.mrf.mxu1  ;;  %v1601_v46 = vsel %vm1498_vm14, %v4703_v45, 0.0 }
 0x331   : > { %v1526_v20 = vsel %vm1498_vm14, %v4674_v22, -inf  ;;  %3757 = vpow2.f32 %v1569_v51 }
 0x332   : > { %1527 = vmax.xlane.f32.xlu2 %v1526_v20  ;;  %1515 = vmax.xlane.f32.xlu0 %v1514_v26 }
 0x336   : > { %v4709_v19 = vpop.f32.mrf.mxu3 }
 0x337   : > { %v1541_v27 = vsel %vm1498_vm14, %v4709_v19, -inf  ;;  %v4722_v53 = vpop.eup %3757 }
 0x338   : > { %v4685_v34 = vpop.f32.mrf.mxu1  ;;  %v1604_v55 = vsel %vm1498_vm14, %v4722_v53, 0.0 }
 0x339   : > { %v1529_v35 = vsel %vm1498_vm14, %v4685_v34, -inf }
 0x33a   : > { %1530 = vmax.xlane.f32.xlu2 %v1529_v35  ;;  %1539 = vmax.xlane.f32.xlu0 %v1538_v36 }
 0x33e   : > { %v4727_v25 = vpop.f32.mrf.mxu3 }
 0x33f   : > { %v1544_v61 = vsel %vm1498_vm14, %v4727_v25, -inf }
 0x340   : > { %v4693_v40 = vpop.f32.mrf.mxu1 }
 0x341   : > { %v1532_v41 = vsel %vm1498_vm14, %v4693_v40, -inf }
 0x342   : > { %1533 = vmax.xlane.f32.xlu1 %v1532_v41  ;;  %1518 = vmax.xlane.f32.xlu0 %v1517_v42 }
 0x343   : > { %1521 = vmax.xlane.f32.xlu2 %v1520_v43 }
 0x34a   : > { %1602 = vadd.xlane.f32.xlu1 %v1601_v46  ;;  %1599 = vadd.xlane.f32.xlu0 %v1598_v47 }
 0x352   : > { %1542 = vmax.xlane.f32.xlu1 %v1541_v27 }
 0x35b   : > { %3676 = vrot.lane.b32.xlu2 %v4607_v57, %s4221_s30 }
 0x35e   : > { %3681 = vrot.lane.b32.xlu0 %v4717_v48, %s4221_s30 }
 0x383   : > { %v1513_v52 = vpop.xlane.xlu1 %1512 }
 0x384   : > { %v1551_v54 = vsub.f32 %v4655_v9, %v1513_v52 }
 0x386   : > { %v1571_v56 = vmul.f32 1.442695, %v1551_v54 }
 0x388   : > { %1605 = vadd.xlane.f32.xlu0 %v1604_v55  ;;  %3759 = vpow2.f32 %v1571_v56 }
 0x38b   : > { %v1537_v59 = vpop.xlane.xlu1 %1536 }
 0x38c   : > { %v1559_v58 = vsub.f32 %v4659_v11, %v1537_v59 }
 0x38e   : > { %v1587_v60 = vmul.f32 1.442695, %v1559_v58  ;;  %v4732_v62 = vpop.eup %3759 }
 0x38f   : > { %v1607_v1 = vsel %vm1498_vm14, %v4732_v62, 0.0 }
 0x390   : > { %3761 = vpow2.f32 %v1587_v60  ;;  %1545 = vmax.xlane.f32.xlu0 %v1544_v61 }
 0x394   : > { %v1597_v13 = vpop.xlane.xlu1 %1596 }
 0x396   : > { %v4734_v63 = vpop.eup %3761 }
 0x397   : > { %v1631_v0 = vsel %vm1498_vm14, %v4734_v63, 0.0 }
 0x398   : > { %1632 = vadd.xlane.f32.xlu1 %v1631_v0  ;;  %1608 = vadd.xlane.f32.xlu0 %v1607_v1 }
 0x39d   : > { %v1525_v2 = vpop.xlane.xlu0 %1524 }
 0x39e   : > { %v1555_v3 = vsub.f32 %v4668_v21, %v1525_v2 }
 0x3a0   : > { %v1579_v4 = vmul.f32 1.442695, %v1555_v3 }
 0x3a2   : > { %3763 = vpow2.f32 %v1579_v4 }
 0x3a5   : > { %v1528_v5 = vpop.xlane.xlu2 %1527  ;;  %v1516_v6 = vpop.xlane.xlu0 %1515 }
 0x3a6   : > { %v1556_v7 = vsub.f32 %v4674_v22, %v1528_v5  ;;  %v1552_v8 = vsub.f32 %v4672_v24, %v1516_v6 }
 0x3a8   : > { %v4743_v9 = vpop.eup %3763  ;;  %v1581_v10 = vmul.f32 1.442695, %v1556_v7  ;;  %v1573_v11 = vmul.f32 1.442695, %v1552_v8 }
 0x3a9   : > { %v1619_v12 = vsel %vm1498_vm14, %v4743_v9, 0.0 }
 0x3aa   : > { %3765 = vpow2.f32 %v1581_v10  ;;  %1620 = vadd.xlane.f32.xlu2 %v1619_v12 }
 0x3ab   : > { %3767 = vpow2.f32 %v1573_v11 }
 0x3ad   : > { %v1531_v15 = vpop.xlane.xlu2 %1530  ;;  %v1540_v16 = vpop.xlane.xlu0 %1539 }
 0x3ae   : > { %v1557_v18 = vsub.f32 %v4685_v34, %v1531_v15  ;;  %v1560_v21 = vsub.f32 %v4682_v28, %v1540_v16 }
 0x3b0   : > { %v4749_v23 = vpop.eup %3765  ;;  %v1583_v24 = vmul.f32 1.442695, %v1557_v18  ;;  %v1589_v22 = vmul.f32 1.442695, %v1560_v21 }
 0x3b1   : > { %v4751_v20 = vpop.eup %3767  ;;  %v1622_v26 = vsel %vm1498_vm14, %v4749_v23, 0.0 }
 0x3b2   : > { %3769 = vpow2.f32 %v1583_v24  ;;  %v1610_v29 = vsel %vm1498_vm14, %v4751_v20, 0.0  ;;  %1623 = vadd.xlane.f32.xlu1 %v1622_v26 }
 0x3b3   : > { %3771 = vpow2.f32 %v1589_v22  ;;  %1611 = vadd.xlane.f32.xlu2 %v1610_v29 }
 0x3b4   : > { %3773 = vrcp.f32 %v1597_v13 }
 0x3b5   : > { %v1534_v30 = vpop.xlane.xlu1 %1533  ;;  %v1519_v32 = vpop.xlane.xlu0 %1518 }
 0x3b6   : > { %v1558_v28 = vsub.f32 %v4693_v40, %v1534_v30  ;;  %v1553_v33 = vsub.f32 %v4680_v31, %v1519_v32  ;;  %v1522_v34 = vpop.xlane.xlu2 %1521 }
 0x3b7   : > { %v1554_v13 = vsub.f32 %v4691_v39, %v1522_v34 }
 0x3b8   : > { %v4759_v35 = vpop.eup %3769  ;;  %v1585_v36 = vmul.f32 1.442695, %v1558_v28  ;;  %v1575_v37 = vmul.f32 1.442695, %v1553_v33 }
 0x3b9   : > { %v4761_v38 = vpop.eup %3771  ;;  %v1625_v41 = vsel %vm1498_vm14, %v4759_v35, 0.0  ;;  %v1577_v15 = vmul.f32 1.442695, %v1554_v13 }
 0x3ba   : > { %3775 = vpow2.f32 %v1585_v36  ;;  %v1634_v42 = vsel %vm1498_vm14, %v4761_v38, 0.0  ;;  %v3774_v43 = vpop.eup %3773 }
 0x3bb   : > { %3777 = vpow2.f32 %v1575_v37  ;;  %1626 = vadd.xlane.f32.xlu2 %v1625_v41  ;;  %1635 = vadd.xlane.f32.xlu0 %v1634_v42  ;;  %v1659_v54 = vmul.f32 %v3774_v43, %v4664_v17 }
 0x3bd   : > { %v1600_v40 = vpop.xlane.xlu0 %1599  ;;  %v1675_v61 = vpack.c.bf16 %v1659_v54, %v1659_v54 }
 0x3be   : > { %v3677_v31 = vpop.permute.xlu2 %3676  ;;  %3779 = vrcp.f32 %v1600_v40 }
 0x3bf   : > { %v3679_v46 = vunpack.i.h.bf16 %v3677_v31  ;;  %v3678_v47 = vunpack.i.l.bf16 %v3677_v31  ;;  %v1709_v2 = vunpack.c.l.b16 %v1675_v61  ;;  %3781 = vpow2.f32 %v1577_v15 }
 0x3c0   : > { %v4767_v27 = vpop.eup %3775 }
 0x3c1   : > { %v4769_v49 = vpop.eup %3777  ;;  %v1696_v50 = vpack.c.bf16 %v3679_v46, %v3679_v46  ;;  %v1695_v51 = vpack.c.bf16 %v3678_v47, %v3678_v47  ;;  %v1628_v52 = vsel %vm1498_vm14, %v4767_v27, 0.0 }
 0x3c2   : > { %v1613_v55 = vsel %vm1498_vm14, %v4769_v49, 0.0 }
 0x3c3   : > { %v1771_v56 = vunpack.c.l.b16 %v1696_v50  ;;  %v1770_v59 = vunpack.c.l.b16 %v1695_v51  ;;  %1629 = vadd.xlane.f32.xlu2 %v1628_v52  ;;  %1614 = vadd.xlane.f32.xlu1 %v1613_v55 }
 0x3c4   : > { %v3780_v58 = vpop.eup %3779 }
 0x3c5   : > { %v1772_v60 = vpack.c.b16 %v1771_v56, %v1770_v59  ;;  %v1660_v0 = vmul.f32 %v3780_v58, %v4701_v44  ;;  %v1603_v44 = vpop.xlane.xlu1 %1602  ;;  %v4786_v24 = vpop.eup %3781 }
 0x3c6   : > { %3783 = vrcp.f32 %v1603_v44  ;;  %v1616_v22 = vsel %vm1498_vm14, %v4786_v24, 0.0 }
 0x3c7   : > { %1784 = vmatpush.bf16.msra.mxu2 %v1772_v60  ;;  %v1676_v1 = vpack.c.bf16 %v1660_v0, %v1660_v0 }
 0x3c9   : > { %v1710_v3 = vunpack.c.l.b16 %v1676_v1 }
 0x3cb   : > { %v1711_v4 = vpack.c.b16 %v1710_v3, %v1709_v2 }
 0x3cc   : > { %v3784_v29 = vpop.eup %3783 }
 0x3cd   : > { %3244 = vmatmul.msk.bf16.vlgmr.msrb.gmra.mxu0 %vm1498_vm14, %v1711_v4  ;;  %v1543_v16 = vpop.xlane.xlu1 %1542  ;;  %v1661_v39 = vmul.f32 %v3784_v29, %v4703_v45 }
 0x3ce   : > { %v1561_v18 = vsub.f32 %v4709_v19, %v1543_v16 }
 0x3cf   : > { %3691 = vrot.lane.b32.xlu0 %v4607_v57, %s4223_s3  ;;  %v1677_v32 = vpack.c.bf16 %v1661_v39, %v1661_v39 }
 0x3d0   : > { %v3682_v17 = vpop.permute.xlu0 %3681  ;;  %v1591_v21 = vmul.f32 1.442695, %v1561_v18 }
 0x3d1   : > { %v3684_v5 = vunpack.i.h.bf16 %v3682_v17  ;;  %v3683_v6 = vunpack.i.l.bf16 %v3682_v17  ;;  %v1737_v41 = vunpack.c.l.b16 %v1677_v32 }
 0x3d2   : > { %3785 = vpow2.f32 %v1591_v21 }
 0x3d3   : > { %v1698_v7 = vpack.c.bf16 %v3684_v5, %v3684_v5  ;;  %v1697_v8 = vpack.c.bf16 %v3683_v6, %v3683_v6 }
 0x3d5   : > { %v1799_v10 = vunpack.c.l.b16 %v1698_v7  ;;  %v1798_v11 = vunpack.c.l.b16 %v1697_v8 }
 0x3d7   : > { %v1800_v12 = vpack.c.b16 %v1799_v10, %v1798_v11 }
 0x3d9   : > { %1812 = vmatpush.bf16.msrb.mxu3 %v1800_v12 }
 0x3db   : > { %3696 = vrot.lane.b32.xlu2 %v4717_v48, %s4222_s9 }
 0x3dc   : > { %3686 = vrot.lane.b32.xlu1 %v4607_v57, %s4222_s9  ;;  %v4790_v57 = vpop.eup %3785 }
 0x3dd   : > { %v1637_v30 = vsel %vm1498_vm14, %v4790_v57, 0.0 }
 0x3f9   : > { %1617 = vadd.xlane.f32.xlu0 %v1616_v22 }
 0x3fb   : > { %v1606_v26 = vpop.xlane.xlu0 %1605 }
 0x3fc   : > { %3787 = vrcp.f32 %v1606_v26 }
 0x401   : > { %1638 = vadd.xlane.f32.xlu0 %v1637_v30 }
 0x402   : > { %v3788_v19 = vpop.eup %3787 }
 0x403   : > { %v1662_v28 = vmul.f32 %v3788_v19, %v4722_v53  ;;  %v1546_v33 = vpop.xlane.xlu0 %1545 }
 0x404   : > { %v1562_v34 = vsub.f32 %v4727_v25, %v1546_v33 }
 0x405   : > { %v1678_v36 = vpack.c.bf16 %v1662_v28, %v1662_v28 }
 0x406   : > { %v1593_v37 = vmul.f32 1.442695, %v1562_v34 }
 0x407   : > { %v1738_v42 = vunpack.c.l.b16 %v1678_v36 }
 0x408   : > { %3789 = vpow2.f32 %v1593_v37 }
 0x409   : > { %v1739_v40 = vpack.c.b16 %v1738_v42, %v1737_v41 }
 0x40b   : > { %3245 = vmatmul.msk.bf16.vlgmr.msrb.gmra.mxu1 %vm1498_vm14, %v1739_v40  ;;  %v1609_v43 = vpop.xlane.xlu0 %1608  ;;  %v1633_v50 = vpop.xlane.xlu1 %1632 }
 0x40c   : > { %3791 = vrcp.f32 %v1609_v43 }
 0x40e   : > { %v4798_v45 = vpop.eup %3789 }
 0x40f   : > { %v1640_v31 = vsel %vm1498_vm14, %v4798_v45, 0.0 }
 0x410   : > { %1641 = vadd.xlane.f32.xlu1 %v1640_v31 }
 0x412   : > { %v3792_v46 = vpop.eup %3791 }
 0x413   : > { %v1663_v47 = vmul.f32 %v3792_v46, %v4732_v62 }
 0x415   : > { %3701 = vrot.lane.b32.xlu0 %v4717_v48, %s4223_s3  ;;  %v1679_v52 = vpack.c.bf16 %v1663_v47, %v1663_v47 }
 0x417   : > { %v1765_v59 = vunpack.c.l.b16 %v1679_v52 }
 0x41d   : > { %v1621_v53 = vpop.xlane.xlu2 %1620 }
 0x425   : > { %v1624_v60 = vpop.xlane.xlu1 %1623 }
 0x426   : > { %v1612_v25 = vpop.xlane.xlu2 %1611 }
 0x427   : > { %3793 = vrcp.f32 %v1612_v25 }
 0x42d   : > { %v3794_v51 = vpop.eup %3793 }
 0x42e   : > { %v1664_v54 = vmul.f32 %v3794_v51, %v4751_v20  ;;  %v1627_v55 = vpop.xlane.xlu2 %1626  ;;  %v1636_v62 = vpop.xlane.xlu0 %1635 }
 0x42f   : > { %3795 = vrcp.f32 %v1627_v55 }
 0x430   : > { %v1680_v56 = vpack.c.bf16 %v1664_v54, %v1664_v54  ;;  %3797 = vrcp.f32 %v1624_v60 }
 0x432   : > { %v1766_v58 = vunpack.c.l.b16 %v1680_v56 }
 0x434   : > { %v1767_v48 = vpack.c.b16 %v1766_v58, %v1765_v59 }
 0x435   : > { %v3796_v0 = vpop.eup %3795 }
 0x436   : > { %v1630_v61 = vpop.xlane.xlu2 %1629  ;;  %3246 = vmatmul.msk.bf16.vlgmr.msra.gmra.mxu2 %vm1498_vm14, %v1767_v48  ;;  %v1669_v1 = vmul.f32 %v3796_v0, %v4759_v35  ;;  %v3798_v2 = vpop.eup %3797 }
 0x437   : > { %3799 = vrcp.f32 %v1630_v61  ;;  %v1668_v6 = vmul.f32 %v3798_v2, %v4749_v23  ;;  %v1615_v30 = vpop.xlane.xlu1 %1614 }
 0x438   : > { %3801 = vrcp.f32 %v1621_v53  ;;  %v1685_v4 = vpack.c.bf16 %v1669_v1, %v1669_v1 }
 0x439   : > { %v1684_v21 = vpack.c.bf16 %v1668_v6, %v1668_v6  ;;  %3803 = vrcp.f32 %v1636_v62 }
 0x43a   : > { %v4811_v15 = vunpack.c.l.b16 %v1685_v4  ;;  %3805 = vrcp.f32 %v1633_v50 }
 0x43b   : > { %v1822_v28 = vunpack.c.l.b16 %v1684_v21  ;;  %3807 = vrcp.f32 %v1615_v30 }
 0x43d   : > { %v3800_v3 = vpop.eup %3799 }
 0x43e   : > { %v3802_v20 = vpop.eup %3801  ;;  %v1670_v17 = vmul.f32 %v3800_v3, %v4767_v27  ;;  %v3697_v5 = vpop.permute.xlu2 %3696 }
 0x43f   : > { %v3699_v7 = vunpack.i.h.bf16 %v3697_v5  ;;  %v3698_v8 = vunpack.i.l.bf16 %v3697_v5  ;;  %v1667_v11 = vmul.f32 %v3802_v20, %v4743_v9  ;;  %v3804_v34 = vpop.eup %3803 }
 0x440   : > { %v1686_v10 = vpack.c.bf16 %v1670_v17, %v1670_v17  ;;  %v3806_v37 = vpop.eup %3805  ;;  %v1672_v42 = vmul.f32 %v3804_v34, %v4761_v38 }
 0x441   : > { %v1706_v12 = vpack.c.bf16 %v3699_v7, %v3699_v7  ;;  %v1705_v44 = vpack.c.bf16 %v3698_v8, %v3698_v8  ;;  %v3692_v13 = vpop.permute.xlu0 %3691  ;;  %v1683_v9 = vpack.c.bf16 %v1667_v11, %v1667_v11  ;;  %v1671_v40 = vmul.f32 %v3806_v37, %v4734_v63  ;;  %v3808_v58 = vpop.eup %3807 }
 0x442   : > { %v4813_v35 = vunpack.c.l.b16 %v1686_v10  ;;  %v3694_v16 = vunpack.i.h.bf16 %v3692_v13  ;;  %v3693_v18 = vunpack.i.l.bf16 %v3692_v13  ;;  %v1688_v25 = vpack.c.bf16 %v1672_v42, %v1672_v42  ;;  %v3457_v42 = vld [vmem:[%s4486_s19 + $0x28] sm:$0xff] }
 0x443   : > { %v1911_v27 = vunpack.c.l.b16 %v1706_v12  ;;  %v1910_v22 = vunpack.c.l.b16 %v1705_v44  ;;  %v1821_v36 = vunpack.c.l.b16 %v1683_v9  ;;  %v1687_v50 = vpack.c.bf16 %v1671_v40, %v1671_v40  ;;  %v3456_v40 = vld [vmem:[%s4486_s19 + $0x20] sm:$0xff] }
 0x444   : > { %v1851_v23 = vpack.c.b16 %v4813_v35, %v4811_v15  ;;  %v1700_v26 = vpack.c.bf16 %v3694_v16, %v3694_v16  ;;  %v1699_v29 = vpack.c.bf16 %v3693_v18, %v3693_v18  ;;  %v1878_v54 = vunpack.c.l.b16 %v1688_v25 }
 0x445   : > { %v1912_v39 = vpack.c.b16 %v1911_v27, %v1910_v22  ;;  %v1823_v41 = vpack.c.b16 %v1822_v28, %v1821_v36  ;;  %v1877_v56 = vunpack.c.l.b16 %v1687_v50  ;;  %v1665_v63 = vmul.f32 %v3808_v58, %v4769_v49  ;;  %v3459_v28 = vld [vmem:[%s4486_s19 + $0x38] sm:$0xff]  ;;  %v3453_v50 = vld [vmem:[%s4486_s19 + $0x8] sm:$0xff] }
 0x446   : > { %v1827_v19 = vunpack.c.l.b16 %v1700_v26  ;;  %v1826_v32 = vunpack.c.l.b16 %v1699_v29 }
 0x447   : > { %1924 = vmatpush.bf16.msra.mxu3 %v1912_v39  ;;  %v1879_v59 = vpack.c.b16 %v1878_v54, %v1877_v56  ;;  %v1681_v48 = vpack.c.bf16 %v1665_v63, %v1665_v63 }
 0x448   : > { %v1828_v33 = vpack.c.b16 %v1827_v19, %v1826_v32 }
 0x449   : > { %v1793_v62 = vunpack.c.l.b16 %v1681_v48 }
 0x44a   : > { %1840 = vmatpush.bf16.msra.mxu0 %v1828_v33  ;;  %v3458_v33 = vld [vmem:[%s4486_s19 + $0x30] sm:$0xff] }
 0x44d   : > { %3248 = vmatmul.msk.bf16.vlgmr.msra.gmra.mxu0 %vm1498_vm14, %v1823_v41 }
 0x44e   : > { %v3687_v31 = vpop.permute.xlu1 %3686  ;;  %2063 = vmatpush.bf16.msrb.mxu0 %v3459_v28 }
 0x44f   : > { %v3689_v53 = vunpack.i.h.bf16 %v3687_v31  ;;  %v3688_v43 = vunpack.i.l.bf16 %v3687_v31 }
 0x451   : > { %v1704_v46 = vpack.c.bf16 %v3689_v53, %v3689_v53  ;;  %v1703_v47 = vpack.c.bf16 %v3688_v43, %v3688_v43  ;;  %v3455_v43 = vld [vmem:[%s4486_s19 + $0x18] sm:$0xff] }
 0x452   : > { %2064 = vmatpush.bf16.msrb.mxu0 %v3458_v33  ;;  %v3842_v33 = vld [vmem:[#allocation2 + $0x8] sm:$0xff] }
 0x453   : > { %v1883_v51 = vunpack.c.l.b16 %v1704_v46  ;;  %v1882_v52 = vunpack.c.l.b16 %v1703_v47  ;;  %v3454_v46 = vld [vmem:[%s4486_s19 + $0x10] sm:$0xff] }
 0x455   : > { %v1884_v55 = vpack.c.b16 %v1883_v51, %v1882_v52  ;;  %v3452_v52 = vld [vmem:[%s4486_s19] sm:$0xff] }
 0x456   : > { %2065 = vmatpush.bf16.msrb.mxu0 %v3457_v42 }
 0x457   : > { %1896 = vmatpush.bf16.msrb.mxu2 %v1884_v55 }
 0x45a   : > { %3250 = vmatmul.msk.bf16.vlgmr.msrb.gmra.mxu2 %vm1498_vm14, %v1879_v59  ;;  %2066 = vmatpush.bf16.msrb.mxu0 %v3456_v40 }
 0x45e   : > { %2067 = vmatpush.bf16.msrb.mxu0 %v3455_v43 }
 0x462   : > { %2068 = vmatpush.bf16.msrb.mxu0 %v3454_v46 }
 0x466   : > { %2069 = vmatpush.bf16.msrb.mxu0 %v3453_v50 }
 0x46a   : > { %2070 = vmatpush.bf16.msrb.mxu0 %v3452_v52 }
 0x46c   : > { %v1618_v38 = vpop.xlane.xlu0 %1617 }
 0x46d   : > { %3809 = vrcp.f32 %v1618_v38 }
 0x473   : > { %v3810_v60 = vpop.eup %3809 }
 0x474   : > { %v1666_v61 = vmul.f32 %v3810_v60, %v4786_v24  ;;  %v1639_v3 = vpop.xlane.xlu0 %1638 }
 0x475   : > { %3811 = vrcp.f32 %v1639_v3 }
 0x476   : > { %v1682_v0 = vpack.c.bf16 %v1666_v61, %v1666_v61 }
 0x478   : > { %v1794_v1 = vunpack.c.l.b16 %v1682_v0 }
 0x47a   : > { %v1795_v2 = vpack.c.b16 %v1794_v1, %v1793_v62 }
 0x47b   : > { %v3812_v4 = vpop.eup %3811 }
 0x47c   : > { %3247 = vmatmul.msk.bf16.vlgmr.msrb.gmra.mxu3 %vm1498_vm14, %v1795_v2  ;;  %v1673_v17 = vmul.f32 %v3812_v4, %v4790_v57  ;;  %v1730_v57 = vpop.f32.mrf.mxu0 }
 0x47e   : > { %v1689_v24 = vpack.c.bf16 %v1673_v17, %v1673_v17 }
 0x480   : > { %v1905_v18 = vunpack.c.l.b16 %v1689_v24 }
 0x483   : > { %v1642_v20 = vpop.xlane.xlu1 %1641 }
 0x484   : > { %3813 = vrcp.f32 %v1642_v20 }
 0x487   : > { %v3702_v5 = vpop.permute.xlu0 %3701 }
 0x488   : > { %v3704_v6 = vunpack.i.h.bf16 %v3702_v5  ;;  %v3703_v49 = vunpack.i.l.bf16 %v3702_v5  ;;  %v1758_v19 = vpop.f32.mrf.mxu1 }
 0x48a   : > { %v3814_v7 = vpop.eup %3813  ;;  %v1702_v8 = vpack.c.bf16 %v3704_v6, %v3704_v6  ;;  %v1701_v10 = vpack.c.bf16 %v3703_v49, %v3703_v49 }
 0x48b   : > { %v1674_v11 = vmul.f32 %v3814_v7, %v4798_v45  ;;  %v1732_v45 = vpop.f32.mrf.mxu0 }
 0x48c   : > { %v1855_v12 = vunpack.c.l.b16 %v1702_v8  ;;  %v1854_v44 = vunpack.c.l.b16 %v1701_v10 }
 0x48d   : > { %v1690_v13 = vpack.c.bf16 %v1674_v11, %v1674_v11 }
 0x48e   : > { %v1856_v16 = vpack.c.b16 %v1855_v12, %v1854_v44 }
 0x48f   : > { %v1906_v21 = vunpack.c.l.b16 %v1690_v13 }
 0x490   : > { %1868 = vmatpush.bf16.msra.mxu1 %v1856_v16  ;;  %v1760_v36 = vpop.f32.mrf.mxu1 }
 0x491   : > { %v1907_v27 = vpack.c.b16 %v1906_v21, %v1905_v18 }
 0x493   : > { %3249 = vmatmul.msk.bf16.vlgmr.msra.gmra.mxu1 %vm1498_vm14, %v1851_v23  ;;  %3251 = vmatmul.msk.bf16.vlgmr.msra.gmra.mxu3 %vm1498_vm14, %v1907_v27  ;;  %v3737_v27 = vld [vmem:[%s757_s11] ss:$0 sm:$0xff] }
 0x4b9   : > { %v1786_v22 = vpop.f32.mrf.mxu2 }
 0x4c1   : > { %v1788_v26 = vpop.f32.mrf.mxu2 }
 0x4c2   : > { %v3705_v29 = vpack.i.bf16 %v1788_v26, %v1786_v22  ;;  %v3839_v26 = vld [vmem:[#allocation2 + $0x10] sm:$0xff] }
 0x4c4   : > { %3706 = vrot.lane.b32.xlu1 %v3705_v29, %s4222_s9 }
 0x4ca   : > { %v1842_v9 = vpop.f32.mrf.mxu0 }
 0x4d2   : > { %v1844_v39 = vpop.f32.mrf.mxu0 }
 0x4d3   : > { %v3710_v30 = vpack.i.bf16 %v1844_v39, %v1842_v9  ;;  %v3840_v39 = vld [vmem:[#allocation2] sm:$0xff] }
 0x4d5   : > { %3711 = vrot.lane.b32.xlu2 %v3710_v30, %s4223_s3 }
 0x4dd   : > { %v1898_v15 = vpop.f32.mrf.mxu2 }
 0x4e5   : > { %v1900_v35 = vpop.f32.mrf.mxu2 }
 0x4e6   : > { %v3715_v23 = vpack.i.bf16 %v1900_v35, %v1898_v15 }
 0x4e8   : > { %3716 = vrot.lane.b32.xlu2 %v3715_v23, %s4221_s30  ;;  %v3841_v23 = vld [vmem:[#allocation2 + $0x18] sm:$0xff] }
 0x4ff   : > { %v1814_v32 = vpop.f32.mrf.mxu3 }
 0x507   : > { %v1816_v34 = vpop.f32.mrf.mxu3 }
 0x508   : > { %v3720_v37 = vpack.i.bf16 %v1816_v34, %v1814_v32 }
 0x50a   : > { %3721 = vrot.lane.b32.xlu0 %v3720_v37, %s4222_s9 }
 0x510   : > { %v1870_v41 = vpop.f32.mrf.mxu1 }
 0x516   : > { %v1926_v31 = vpop.f32.mrf.mxu3 }
 0x518   : > { %v1872_v53 = vpop.f32.mrf.mxu1 }
 0x519   : > { %v3725_v25 = vpack.i.bf16 %v1872_v53, %v1870_v41 }
 0x51b   : > { %3726 = vrot.lane.b32.xlu2 %v3725_v25, %s4223_s3 }
 0x51e   : > { %v1928_v47 = vpop.f32.mrf.mxu3 }
 0x51f   : > { %v3730_v51 = vpack.i.bf16 %v1928_v47, %v1926_v31 }
 0x521   : > { %3731 = vrot.lane.b32.xlu1 %v3730_v51, %s4221_s30 }
 0x52f   : > { %v3712_v54 = vpop.permute.xlu2 %3711 }
 0x530   : > { %v3714_v63 = vunpack.i.h.bf16 %v3712_v54  ;;  %v3713_v60 = vunpack.i.l.bf16 %v3712_v54 }
 0x536   : > { %v3707_v55 = vpop.permute.xlu1 %3706 }
 0x537   : > { %v3709_v56 = vunpack.i.h.bf16 %v3707_v55  ;;  %v3708_v59 = vunpack.i.l.bf16 %v3707_v55 }
 0x539   : > { %v1980_v38 = vsel %vm1267_vm13, %v1732_v45, %v3709_v56  ;;  %v1979_v58 = vsel %vm1267_vm13, %v1730_v57, %v3708_v59  ;;  %v3342_v56 = vld [vmem:[%s4495_s0 + $0x70] sm:$0xf]  ;;  %v3475_v59 = vld [vmem:[%s4495_s0 + $0x74] sm:$0xf0] }
 0x53a   : > { %v1984_v62 = vsel %vm1983_vm15, %v1979_v58, %v3713_v60  ;;  %v1985_v1 = vsel %vm1983_vm15, %v1980_v38, %v3714_v63  ;;  %v3474_v38 = vld [vmem:[%s4495_s0 + $0x74] sm:$0xf]  ;;  %v3343_v58 = vor.u32 %v3475_v59, %v3342_v56  ;;  %v3344_v63 = vld [vmem:[%s4495_s0 + $0x78] sm:$0xf0] }
 0x53b   : > { %v3347_v60 = vor.u32 %v3474_v38, %v3344_v63 }
 0x53c   : > { %2286 = vmatpush.bf16.msrb.mxu1 %v3343_v58 }
 0x53d   : > { %2305 = vmatpush.bf16.msra.mxu2 %v3347_v60 }
 0x542   : > { %v3717_v48 = vpop.permute.xlu2 %3716 }
 0x543   : > { %v3719_v61 = vunpack.i.h.bf16 %v3717_v48  ;;  %v3718_v0 = vunpack.i.l.bf16 %v3717_v48  ;;  %v3334_v48 = vld [vmem:[%s4495_s0 + $0x60] sm:$0xf] }
 0x545   : > { %v1989_v2 = vsel %vm1988_vm0, %v1984_v62, %v3718_v0  ;;  %v1990_v3 = vsel %vm1988_vm0, %v1985_v1, %v3719_v61  ;;  %v3473_v61 = vld [vmem:[%s4495_s0 + $0x64] sm:$0xf0]  ;;  %v3472_v0 = vld [vmem:[%s4495_s0 + $0x64] sm:$0xf]  ;;  %v3336_v1 = vld [vmem:[%s4495_s0 + $0x68] sm:$0xf0] }
 0x546   : > { %v1993_v20 = vpack.c.bf16 %v1990_v3, %v1989_v2  ;;  %v3335_v62 = vor.u32 %v3473_v61, %v3334_v48  ;;  %v3339_v2 = vor.u32 %v3472_v0, %v3336_v1  ;;  %v3326_v3 = vld [vmem:[%s4495_s0 + $0x50] sm:$0xf] }
 0x548   : > { %2071 = vmatmul.bf16.vlgmr.msrb.gmra.mxu0 %v1993_v20  ;;  %2287 = vmatpush.bf16.msrb.mxu1 %v3335_v62  ;;  %v3471_v20 = vld [vmem:[%s4495_s0 + $0x54] sm:$0xf0] }
 0x549   : > { %2306 = vmatpush.bf16.msra.mxu2 %v3339_v2 }
 0x575   : > { %v3727_v6 = vpop.permute.xlu2 %3726 }
 0x576   : > { %v3729_v8 = vunpack.i.h.bf16 %v3727_v6  ;;  %v3728_v10 = vunpack.i.l.bf16 %v3727_v6 }
 0x57c   : > { %v3722_v4 = vpop.permute.xlu0 %3721 }
 0x57d   : > { %v3724_v17 = vunpack.i.h.bf16 %v3722_v4  ;;  %v3723_v5 = vunpack.i.l.bf16 %v3722_v4  ;;  %v3470_v4 = vld [vmem:[%s4495_s0 + $0x54] sm:$0xf] }
 0x57f   : > { %v1982_v49 = vsel %vm1267_vm13, %v1760_v36, %v3724_v17  ;;  %v1981_v7 = vsel %vm1267_vm13, %v1758_v19, %v3723_v5  ;;  %v3327_v17 = vor.u32 %v3471_v20, %v3326_v3  ;;  %v3328_v5 = vld [vmem:[%s4495_s0 + $0x58] sm:$0xf0]  ;;  %v3738_v3 = vld [vmem:[%s647_s16] ss:$0 sm:$0xff] }
 0x580   : > { %v1986_v44 = vsel %vm1983_vm15, %v1981_v7, %v3728_v10  ;;  %v1987_v13 = vsel %vm1983_vm15, %v1982_v49, %v3729_v8  ;;  %v3331_v6 = vor.u32 %v3470_v4, %v3328_v5  ;;  %v3318_v49 = vld [vmem:[%s4495_s0 + $0x40] sm:$0xf]  ;;  %v3469_v7 = vld [vmem:[%s4495_s0 + $0x44] sm:$0xf0]  ;;  %v3468_v8 = vld [vmem:[%s4495_s0 + $0x44] sm:$0xf] }
 0x581   : > { %2288 = vmatpush.bf16.msrb.mxu1 %v3327_v17  ;;  %v3319_v10 = vor.u32 %v3469_v7, %v3318_v49 }
 0x582   : > { %2307 = vmatpush.bf16.msra.mxu2 %v3331_v6 }
 0x585   : > { %2289 = vmatpush.bf16.msrb.mxu1 %v3319_v10 }
 0x593   : > { %v3732_v24 = vpop.permute.xlu1 %3731 }
 0x594   : > { %v3734_v11 = vunpack.i.h.bf16 %v3732_v24  ;;  %v3733_v12 = vunpack.i.l.bf16 %v3732_v24  ;;  %v3320_v24 = vld [vmem:[%s4495_s0 + $0x48] sm:$0xf0] }
 0x596   : > { %v1991_v16 = vsel %vm1988_vm0, %v1986_v44, %v3733_v12  ;;  %v1992_v18 = vsel %vm1988_vm0, %v1987_v13, %v3734_v11  ;;  %v3323_v11 = vor.u32 %v3468_v8, %v3320_v24  ;;  %v3310_v12 = vld [vmem:[%s4495_s0 + $0x30] sm:$0xf]  ;;  %v3467_v44 = vld [vmem:[%s4495_s0 + $0x34] sm:$0xf0]  ;;  %v3466_v13 = vld [vmem:[%s4495_s0 + $0x34] sm:$0xf] }
 0x597   : > { %v1994_v21 = vpack.c.bf16 %v1992_v18, %v1991_v16  ;;  %v3311_v16 = vor.u32 %v3467_v44, %v3310_v12  ;;  %v3312_v18 = vld [vmem:[%s4495_s0 + $0x38] sm:$0xf0] }
 0x598   : > { %2308 = vmatpush.bf16.msra.mxu2 %v3323_v11 }
 0x599   : > { %2076 = vmatmul.bf16.gmra.mxu0 %v1994_v21  ;;  %v3315_v21 = vor.u32 %v3466_v13, %v3312_v18  ;;  %2290 = vmatpush.bf16.msrb.mxu1 %v3311_v16 }
 0x59c   : > { %2309 = vmatpush.bf16.msra.mxu2 %v3315_v21 }
 0x5c5   : > { %v2072_v57 = vpop.f32.mrf.mxu0 }
 0x5c6   : > { %v2073_v22 = vadd.f32 %v3737_v27, %v2072_v57  ;;  %v3465_v57 = vld [vmem:[%s4495_s0 + $0x24] sm:$0xf0] }
 0x5c8   : > { %v4862_v45 = vadd.f32 %v3839_v26, %v2073_v22  ;;  %v3464_v22 = vld [vmem:[%s4495_s0 + $0x24] sm:$0xf] }
 0x5ca   : > { %2088 = vadd.xlane.f32.xlu0 %v4862_v45 }
 0x5cd   : > { %v2074_v29 = vpop.f32.mrf.mxu0 }
 0x5ce   : > { %v2075_v9 = vadd.f32 %v3737_v27, %v2074_v29  ;;  %v3304_v29 = vld [vmem:[%s4495_s0 + $0x28] sm:$0xf0] }
 0x5d0   : > { %v4865_v30 = vadd.f32 %v3840_v39, %v2075_v9  ;;  %v3307_v9 = vor.u32 %v3464_v22, %v3304_v29  ;;  %v3294_v39 = vld [vmem:[%s4495_s0 + $0x10] sm:$0xf] }
 0x5d2   : > { %2090 = vadd.xlane.f32.xlu2 %v4865_v30  ;;  %2310 = vmatpush.bf16.msra.mxu2 %v3307_v9 }
 0x616   : > { %v2077_v15 = vpop.f32.mrf.mxu0 }
 0x617   : > { %v2078_v35 = vadd.f32 %v3737_v27, %v2077_v15  ;;  %v3463_v15 = vld [vmem:[%s4495_s0 + $0x14] sm:$0xf0] }
 0x619   : > { %v4868_v19 = vadd.f32 %v3841_v23, %v2078_v35  ;;  %v3462_v35 = vld [vmem:[%s4495_s0 + $0x14] sm:$0xf]  ;;  %v3295_v23 = vor.u32 %v3463_v15, %v3294_v39 }
 0x61b   : > { %2092 = vadd.xlane.f32.xlu1 %v4868_v19 }
 0x61e   : > { %v2079_v32 = vpop.f32.mrf.mxu0 }
 0x61f   : > { %v2080_v28 = vadd.f32 %v3737_v27, %v2079_v32  ;;  %v3302_v27 = vld [vmem:[%s4495_s0 + $0x20] sm:$0xf]  ;;  %v3296_v32 = vld [vmem:[%s4495_s0 + $0x18] sm:$0xf0] }
 0x620   : > { %v3303_v26 = vor.u32 %v3465_v57, %v3302_v27 }
 0x621   : > { %v4871_v34 = vadd.f32 %v3842_v33, %v2080_v28  ;;  %v3286_v28 = vld [vmem:[%s4495_s0] sm:$0xf]  ;;  %v3461_v33 = vld [vmem:[%s4495_s0 + $0x4] sm:$0xf0] }
 0x622   : > { %2291 = vmatpush.bf16.msrb.mxu1 %v3303_v26 }
 0x623   : > { %2094 = vadd.xlane.f32.xlu0 %v4871_v34 }
 0x626   : > { %2292 = vmatpush.bf16.msrb.mxu1 %v3295_v23 }
 0x63d   : > { %v2089_v36 = vpop.xlane.xlu0 %2088 }
 0x63e   : > { %v2096_v37 = vmul.f32 %v2089_v36, %v4522_v14 }
 0x640   : > { %v4876_v41 = vsub.f32 %v4862_v45, %v2096_v37  ;;  %v3299_v37 = vor.u32 %v3462_v35, %v3296_v32 }
 0x642   : > { %v2104_v42 = vmul.f32 %v4876_v41, %v4876_v41  ;;  %2311 = vmatpush.bf16.msra.mxu2 %v3299_v37 }
 0x644   : > { %2108 = vadd.xlane.f32.xlu2 %v2104_v42  ;;  %v3460_v42 = vld [vmem:[%s4495_s0 + $0x4] sm:$0xf] }
 0x645   : > { %v2091_v40 = vpop.xlane.xlu2 %2090 }
 0x646   : > { %v2097_v31 = vmul.f32 %v2091_v40, %v4522_v14  ;;  %v3288_v40 = vld [vmem:[%s4495_s0 + $0x8] sm:$0xf0]  ;;  %s5260_s0 = scalar_lea.vmem [#allocation14], %s4470_s14 }
 0x647   : > { %v3739_v6 = vld [vmem:[%s5260_s0] ss:$0 sm:$0xff] }
 0x648   : > { %v4882_v53 = vsub.f32 %v4865_v30, %v2097_v31 }
 0x64a   : > { %v2105_v43 = vmul.f32 %v4882_v53, %v4882_v53 }
 0x64c   : > { %2110 = vadd.xlane.f32.xlu1 %v2105_v43  ;;  %v3287_v43 = vor.u32 %v3461_v33, %v3286_v28 }
 0x64e   : > { %2293 = vmatpush.bf16.msrb.mxu1 %v3287_v43 }
 0x68e   : > { %v2093_v25 = vpop.xlane.xlu1 %2092 }
 0x68f   : > { %v2098_v46 = vmul.f32 %v2093_v25, %v4522_v14  ;;  %v3291_v25 = vor.u32 %v3460_v42, %v3288_v40  ;;  %v2200_v40 = vld [vmem:[%s4513_s29] sm:$0x3] }
 0x691   : > { %v4888_v47 = vsub.f32 %v4868_v19, %v2098_v46  ;;  %2312 = vmatpush.bf16.msra.mxu2 %v3291_v25 }
 0x693   : > { %v2106_v50 = vmul.f32 %v4888_v47, %v4888_v47 }
 0x695   : > { %2112 = vadd.xlane.f32.xlu0 %v2106_v50 }
 0x696   : > { %v2095_v51 = vpop.xlane.xlu0 %2094 }
 0x697   : > { %v2099_v52 = vmul.f32 %v2095_v51, %v4522_v14 }
 0x699   : > { %v4894_v54 = vsub.f32 %v4871_v34, %v2099_v52 }
 0x69b   : > { %v2107_v55 = vmul.f32 %v4894_v54, %v4894_v54 }
 0x69d   : > { %2114 = vadd.xlane.f32.xlu2 %v2107_v55 }
 0x6b7   : > { %v2109_v36 = vpop.xlane.xlu2 %2108 }
 0x6b8   : > { %v2116_v31 = vmul.f32 %v2109_v36, %v4522_v14 }
 0x6ba   : > { %v2120_v46 = vadd.f32 1e-05, %v2116_v31  ;;  %v4943_v31 = vperm.slane %v2200_v40, 0 }
 0x6bc   : > { %3815 = vrsqrt.f32 %v2120_v46  ;;  %vm2130_vm2 = vweird.f32 %v2120_v46 }
 0x6bf   : > { %v2111_v50 = vpop.xlane.xlu1 %2110 }
 0x6c0   : > { %v2117_v51 = vmul.f32 %v2111_v50, %v4522_v14 }
 0x6c2   : > { %v3816_v52 = vpop.eup %3815  ;;  %v2121_v55 = vadd.f32 1e-05, %v2117_v51 }
 0x6c3   : > { %v2125_v56 = vmul.f32 %v3816_v52, %v2120_v46  ;;  %vm2131_vm1 = vweird.f32 %v3816_v52 }
 0x6c4   : > { %3817 = vrsqrt.f32 %v2121_v55  ;;  %vm2132_vm3 = vmor %vm2130_vm2, %vm2131_vm1  ;;  %vm2140_vm5 = vweird.f32 %v2121_v55 }
 0x6c5   : > { %v2126_v59 = vmul.f32 %v3816_v52, %v2125_v56 }
 0x6c7   : > { %v2127_v38 = vmul.f32 0.5, %v2126_v59 }
 0x6c9   : > { %v2128_v58 = vsub.f32 1.5, %v2127_v38 }
 0x6ca   : > { %v3818_v63 = vpop.eup %3817 }
 0x6cb   : > { %v2129_v60 = vmul.f32 %v3816_v52, %v2128_v58  ;;  %v2135_v48 = vmul.f32 %v3818_v63, %v2121_v55  ;;  %vm2141_vm4 = vweird.f32 %v3818_v63  ;;  %v3483_v55 = vld [vmem:[%s4519_s27 + $0x38] sm:$0xff] }
 0x6cc   : > { %vm2142_vm6 = vmor %vm2140_vm5, %vm2141_vm4  ;;  %2812 = vmatpush.bf16.msrb.mxu3 %v3483_v55 }
 0x6cd   : > { %v2136_v61 = vmul.f32 %v3818_v63, %v2135_v48  ;;  %v2133_v0 = vsel %vm2132_vm3, %v3816_v52, %v2129_v60  ;;  %v3482_v48 = vld [vmem:[%s4519_s27 + $0x30] sm:$0xff] }
 0x6ce   : > { %v2164_v2 = vmul.f32 %v2133_v0, %v4876_v41 }
 0x6cf   : > { %v2137_v62 = vmul.f32 0.5, %v2136_v61 }
 0x6d0   : > { %v2171_v5 = vmul.f32 %v3738_v3, %v2164_v2  ;;  %2813 = vmatpush.bf16.msrb.mxu3 %v3482_v48  ;;  %v3491_v2 = vld [vmem:[%s4519_s27 + $0x78] sm:$0xff] }
 0x6d1   : > { %v2138_v1 = vsub.f32 1.5, %v2137_v62  ;;  %2831 = vmatpush.bf16.msra.mxu0 %v3491_v2  ;;  %v3487_v2 = vld [vmem:[%s4519_s27 + $0x58] sm:$0xff] }
 0x6d2   : > { %v2178_v7 = vadd.f32 %v3739_v6, %v2171_v5 }
 0x6d3   : > { %v2139_v20 = vmul.f32 %v3818_v63, %v2138_v1 }
 0x6d5   : > { %v2143_v4 = vsel %vm2142_vm6, %v3818_v63, %v2139_v20 }
 0x6d6   : > { %v2165_v17 = vmul.f32 %v2143_v4, %v4882_v53 }
 0x6d8   : > { %v2172_v49 = vmul.f32 %v3738_v3, %v2165_v17 }
 0x6da   : > { %v2179_v8 = vadd.f32 %v3739_v6, %v2172_v49 }
 0x6dc   : > { %v2182_v10 = vpack.c.bf16 %v2179_v8, %v2178_v7 }
 0x6de   : > { %2294 = vmatmul.bf16.vlgmr.msrb.gmra.mxu1 %v2182_v10  ;;  %2313 = vmatmul.bf16.vlgmr.msra.gmra.mxu2 %v2182_v10 }
 0x708   : > { %v2113_v24 = vpop.xlane.xlu0 %2112 }
 0x709   : > { %v2118_v41 = vmul.f32 %v2113_v24, %v4522_v14 }
 0x70b   : > { %v2122_v11 = vadd.f32 1e-05, %v2118_v41  ;;  %v3490_v41 = vld [vmem:[%s4519_s27 + $0x70] sm:$0xff] }
 0x70c   : > { %2832 = vmatpush.bf16.msra.mxu0 %v3490_v41 }
 0x70d   : > { %3819 = vrsqrt.f32 %v2122_v11  ;;  %vm2150_vm8 = vweird.f32 %v2122_v11 }
 0x710   : > { %v2115_v12 = vpop.xlane.xlu2 %2114 }
 0x711   : > { %v2119_v44 = vmul.f32 %v2115_v12, %v4522_v14 }
 0x713   : > { %v3820_v13 = vpop.eup %3819  ;;  %v2123_v16 = vadd.f32 1e-05, %v2119_v44 }
 0x714   : > { %v2145_v53 = vmul.f32 %v3820_v13, %v2122_v11  ;;  %vm2151_vm7 = vweird.f32 %v3820_v13 }
 0x715   : > { %3821 = vrsqrt.f32 %v2123_v16  ;;  %vm2152_vm9 = vmor %vm2150_vm8, %vm2151_vm7  ;;  %vm2160_vm11 = vweird.f32 %v2123_v16 }
 0x716   : > { %v2146_v18 = vmul.f32 %v3820_v13, %v2145_v53 }
 0x718   : > { %v2147_v21 = vmul.f32 0.5, %v2146_v18 }
 0x71a   : > { %v2148_v27 = vsub.f32 1.5, %v2147_v21 }
 0x71b   : > { %v3822_v57 = vpop.eup %3821 }
 0x71c   : > { %v2149_v22 = vmul.f32 %v3820_v13, %v2148_v27  ;;  %v2155_v26 = vmul.f32 %v3822_v57, %v2123_v16  ;;  %vm2161_vm10 = vweird.f32 %v3822_v57  ;;  %v3480_v27 = vld [vmem:[%s4519_s27 + $0x20] sm:$0xff] }
 0x71d   : > { %vm2162_vm12 = vmor %vm2160_vm11, %vm2161_vm10 }
 0x71e   : > { %v2156_v29 = vmul.f32 %v3822_v57, %v2155_v26  ;;  %v2153_v39 = vsel %vm2152_vm9, %v3820_v13, %v2149_v22 }
 0x71f   : > { %v2166_v14 = vmul.f32 %v2153_v39, %v4888_v47 }
 0x720   : > { %v2157_v9 = vmul.f32 0.5, %v2156_v29 }
 0x721   : > { %v2173_v28 = vmul.f32 %v3738_v3, %v2166_v14 }
 0x722   : > { %v2158_v15 = vsub.f32 1.5, %v2157_v9  ;;  %v3489_v9 = vld [vmem:[%s4519_s27 + $0x68] sm:$0xff] }
 0x723   : > { %v2180_v36 = vadd.f32 %v3739_v6, %v2173_v28  ;;  %2833 = vmatpush.bf16.msra.mxu0 %v3489_v9 }
 0x724   : > { %v2159_v35 = vmul.f32 %v3822_v57, %v2158_v15 }
 0x726   : > { %v2163_v23 = vsel %vm2162_vm12, %v3822_v57, %v2159_v35 }
 0x727   : > { %v2167_v32 = vmul.f32 %v2163_v23, %v4894_v54  ;;  %v4951_v54 = vperm.slane %v2200_v40, 1 }
 0x729   : > { %v2174_v33 = vmul.f32 %v3738_v3, %v2167_v32 }
 0x72b   : > { %v2181_v37 = vadd.f32 %v3739_v6, %v2174_v33  ;;  %v3481_v6 = vld [vmem:[%s4519_s27 + $0x28] sm:$0xff]  ;;  %v3479_v33 = vld [vmem:[%s4519_s27 + $0x18] sm:$0xff] }
 0x72c   : > { %2814 = vmatpush.bf16.msrb.mxu3 %v3481_v6  ;;  %v3477_v6 = vld [vmem:[%s4519_s27 + $0x8] sm:$0xff] }
 0x72d   : > { %v2183_v42 = vpack.c.bf16 %v2181_v37, %v2180_v36 }
 0x72f   : > { %2299 = vmatmul.bf16.gmra.mxu1 %v2183_v42  ;;  %2318 = vmatmul.bf16.gmra.mxu2 %v2183_v42 }
 0x730   : > { %2815 = vmatpush.bf16.msrb.mxu3 %v3480_v27  ;;  %v3476_v27 = vld [vmem:[%s4519_s27] sm:$0xff] }
 0x734   : > { %2816 = vmatpush.bf16.msrb.mxu3 %v3479_v33 }
 0x75b   : > { %v2295_v43 = vpop.f32.mrf.mxu1 }
 0x75c   : > { %v4946_v47 = vadd.f32 %v2295_v43, %v4943_v31  ;;  %v3488_v43 = vld [vmem:[%s4519_s27 + $0x60] sm:$0xff] }
 0x75d   : > { %2834 = vmatpush.bf16.msra.mxu0 %v3488_v43 }
 0x75e   : > { %v4949_v25 = vmul.f32 0.70710677, %v4946_v47 }
 0x760   : > { %v2340_v46 = vmul.f32 %v4949_v25, %v4949_v25 }
 0x761   : > { %v2314_v50 = vpop.f32.mrf.mxu2  ;;  %2835 = vmatpush.bf16.msra.mxu0 %v3487_v2 }
 0x762   : > { %v4955_v51 = vmin.f32 %v2340_v46, 16.0  ;;  %v4958_v52 = vadd.f32 %v2314_v50, %v4951_v54 }
 0x763   : > { %v2297_v56 = vpop.f32.mrf.mxu1 }
 0x764   : > { %v2342_v59 = vmul.f32 2.1237322e-06, %v4955_v51  ;;  %v2353_v38 = vmul.f32 3.8918573e-05, %v4955_v51  ;;  %v4964_v58 = vadd.f32 %v2297_v56, %v4943_v31  ;;  %v4967_v63 = vmul.f32 0.70710677, %v4958_v52 }
 0x766   : > { %v2354_v60 = vadd.f32 0.001143296, %v2353_v38  ;;  %v2343_v61 = vadd.f32 0.00028619796, %v2342_v59  ;;  %v2380_v0 = vmul.f32 %v4967_v63, %v4967_v63  ;;  %v4973_v62 = vmul.f32 0.70710677, %v4964_v58 }
 0x767   : > { %v3478_v38 = vld [vmem:[%s4519_s27 + $0x10] sm:$0xff] }
 0x768   : > { %v2355_v1 = vmul.f32 %v2354_v60, %v4955_v51  ;;  %v4977_v3 = vmin.f32 %v2380_v0, 16.0  ;;  %v2420_v20 = vmul.f32 %v4973_v62, %v4973_v62  ;;  %v2344_v49 = vmul.f32 %v2343_v61, %v4955_v51  ;;  %2817 = vmatpush.bf16.msrb.mxu3 %v3478_v38 }
 0x769   : > { %v2316_v4 = vpop.f32.mrf.mxu2 }
 0x76a   : > { %v2356_v17 = vadd.f32 0.014752088, %v2355_v1  ;;  %v4982_v5 = vadd.f32 %v2316_v4, %v4951_v54  ;;  %v2393_v7 = vmul.f32 3.8918573e-05, %v4977_v3  ;;  %v4987_v8 = vmin.f32 %v2420_v20, 16.0 }
 0x76b   : > { %v2382_v11 = vmul.f32 2.1237322e-06, %v4977_v3  ;;  %v2345_v18 = vadd.f32 0.0036580483, %v2344_v49 }
 0x76c   : > { %v2357_v10 = vmul.f32 %v2356_v17, %v4955_v51  ;;  %v4991_v24 = vmul.f32 0.70710677, %v4982_v5  ;;  %v2394_v12 = vadd.f32 0.001143296, %v2393_v7  ;;  %v2422_v44 = vmul.f32 2.1237322e-06, %v4987_v8  ;;  %2818 = vmatpush.bf16.msrb.mxu3 %v3477_v6 }
 0x76d   : > { %v2433_v16 = vmul.f32 3.8918573e-05, %v4987_v8  ;;  %v2383_v39 = vadd.f32 0.00028619796, %v2382_v11  ;;  %v2346_v36 = vmul.f32 %v2345_v18, %v4955_v51 }
 0x76e   : > { %v2358_v13 = vadd.f32 0.112945676, %v2357_v10  ;;  %v2460_v53 = vmul.f32 %v4991_v24, %v4991_v24  ;;  %v2395_v21 = vmul.f32 %v2394_v12, %v4977_v3  ;;  %v2423_v22 = vadd.f32 0.00028619796, %v2422_v44  ;;  %v3486_v44 = vld [vmem:[%s4519_s27 + $0x50] sm:$0xff] }
 0x76f   : > { %v2434_v26 = vadd.f32 0.001143296, %v2433_v16  ;;  %v2384_v46 = vmul.f32 %v2383_v39, %v4977_v3  ;;  %v2347_v61 = vadd.f32 0.05243302, %v2346_v36  ;;  %2836 = vmatpush.bf16.msra.mxu0 %v3486_v44  ;;  %v3485_v39 = vld [vmem:[%s4519_s27 + $0x48] sm:$0xff] }
 0x770   : > { %v2359_v57 = vmul.f32 %v2358_v13, %v4955_v51  ;;  %v5002_v29 = vmin.f32 %v2460_v53, 16.0  ;;  %v2396_v15 = vadd.f32 0.014752088, %v2395_v21  ;;  %v2424_v42 = vmul.f32 %v2423_v22, %v4987_v8  ;;  %2819 = vmatpush.bf16.msrb.mxu3 %v3476_v27 }
 0x771   : > { %v2435_v35 = vmul.f32 %v2434_v26, %v4987_v8  ;;  %v2385_v20 = vadd.f32 0.0036580483, %v2384_v46  ;;  %v2348_v10 = vmul.f32 %v2347_v61, %v4955_v51 }
 0x772   : > { %v2360_v14 = vadd.f32 0.4994258, %v2359_v57  ;;  %v2397_v23 = vmul.f32 %v2396_v15, %v4977_v3  ;;  %v2462_v32 = vmul.f32 2.1237322e-06, %v5002_v29  ;;  %v2473_v28 = vmul.f32 3.8918573e-05, %v5002_v29 }
 0x773   : > { %v2436_v40 = vadd.f32 0.014752088, %v2435_v35  ;;  %v2425_v0 = vadd.f32 0.0036580483, %v2424_v42  ;;  %v2386_v13 = vmul.f32 %v2385_v20, %v4977_v3  ;;  %v2349_v26 = vadd.f32 0.18741608, %v2348_v10  ;;  %2837 = vmatpush.bf16.msra.mxu0 %v3485_v39 }
 0x774   : > { %v2361_v37 = vmul.f32 %v2360_v14, %v4955_v51  ;;  %v2398_v50 = vadd.f32 0.112945676, %v2397_v23  ;;  %v2474_v55 = vadd.f32 0.001143296, %v2473_v28  ;;  %v2463_v48 = vadd.f32 0.00028619796, %v2462_v32 }
 0x775   : > { %v2437_v59 = vmul.f32 %v2436_v40, %v4987_v8  ;;  %v2426_v41 = vmul.f32 %v2425_v0, %v4987_v8  ;;  %v2387_v14 = vadd.f32 0.05243302, %v2386_v13  ;;  %v3484_v40 = vld [vmem:[%s4519_s27 + $0x40] sm:$0xff] }
 0x776   : > { %v5015_v56 = vadd.f32 1.0, %v2361_v37  ;;  %v2399_v60 = vmul.f32 %v2398_v50, %v4977_v3  ;;  %v2475_v1 = vmul.f32 %v2474_v55, %v5002_v29  ;;  %v2464_v7 = vmul.f32 %v2463_v48, %v5002_v29 }
 0x777   : > { %v2438_v17 = vadd.f32 0.112945676, %v2437_v59  ;;  %v2427_v9 = vadd.f32 0.05243302, %v2426_v41  ;;  %v2350_v37 = vmul.f32 %v2349_v26, %v4955_v51  ;;  %v2388_v50 = vmul.f32 %v2387_v14, %v4977_v3  ;;  %2838 = vmatpush.bf16.msra.mxu0 %v3484_v40 }
 0x778   : > { %3823 = vrcp.f32 %v5015_v56  ;;  %v2400_v4 = vadd.f32 0.4994258, %v2399_v60  ;;  %v2476_v12 = vadd.f32 0.014752088, %v2475_v1  ;;  %v2465_v22 = vadd.f32 0.0036580483, %v2464_v7 }
 0x779   : > { %v2439_v11 = vmul.f32 %v2438_v17, %v4987_v8  ;;  %v2428_v42 = vmul.f32 %v2427_v9, %v4987_v8  ;;  %v2374_v55 = vand.u32 2147483648, %v5015_v56  ;;  %vm2368_vm14 = vweird.f32 %v5015_v56 }
 0x77a   : > { %v2401_v49 = vmul.f32 %v2400_v4, %v4977_v3  ;;  %v2477_v21 = vmul.f32 %v2476_v12, %v5002_v29  ;;  %v2466_v33 = vmul.f32 %v2465_v22, %v5002_v29  ;;  %v2372_v38 = vand.u32 2147483647, %v5015_v56 }
 0x77b   : > { %v2440_v18 = vadd.f32 0.4994258, %v2439_v11  ;;  %v2429_v61 = vadd.f32 0.18741608, %v2428_v42  ;;  %v2351_v0 = vadd.f32 1.1283791, %v2350_v37 }
 0x77c   : > { %v5031_v16 = vadd.f32 1.0, %v2401_v49  ;;  %v2478_v23 = vadd.f32 0.112945676, %v2477_v21  ;;  %v2467_v51 = vadd.f32 0.05243302, %v2466_v33  ;;  %v2375_v4 = vor.u32 1.1754944e-38, %v2374_v55 }
 0x77d   : > { %v2441_v35 = vmul.f32 %v2440_v18, %v4987_v8  ;;  %v2389_v2 = vadd.f32 0.18741608, %v2388_v50  ;;  %vm2373_vm0 = vcmp.eq.f32.partialorder %v2372_v38, 8.507059e+37  ;;  %v2352_v11 = vmul.f32 %v2351_v0, %v4949_v25 }
 0x77e   : > { %v3824_v53 = vpop.eup %3823  ;;  %3825 = vrcp.f32 %v5031_v16  ;;  %v2479_v36 = vmul.f32 %v2478_v23, %v5002_v29  ;;  %v2468_v49 = vmul.f32 %v2467_v51, %v5002_v29  ;;  %vm2408_vm1 = vweird.f32 %v5031_v16 }
 0x77f   : > { %v2364_v57 = vmul.f32 %v3824_v53, %v5015_v56  ;;  %v5039_v28 = vadd.f32 1.0, %v2441_v35  ;;  %vm2369_vm13 = vweird.f32 %v3824_v53  ;;  %v2430_v56 = vmul.f32 %v2429_v61, %v4987_v8 }
 0x780   : > { %v2480_v60 = vadd.f32 0.4994258, %v2479_v36  ;;  %vm2370_vm15 = vmor %vm2368_vm14, %vm2369_vm13  ;;  %v2390_v12 = vmul.f32 %v2389_v2, %v4977_v3  ;;  %v2412_v13 = vand.u32 2147483647, %v5031_v16  ;;  %v2414_v21 = vand.u32 2147483648, %v5031_v16 }
 0x781   : > { %v2365_v15 = vsub.f32 1.0, %v2364_v57  ;;  %3827 = vrcp.f32 %v5039_v28  ;;  %v2454_v27 = vand.u32 2147483648, %v5039_v28  ;;  %v2469_v8 = vadd.f32 0.18741608, %v2468_v49 }
 0x782   : > { %v2481_v20 = vmul.f32 %v2480_v60, %v5002_v29  ;;  %v2431_v57 = vadd.f32 1.1283791, %v2430_v56  ;;  %v2452_v25 = vand.u32 2147483647, %v5039_v28  ;;  %v2391_v3 = vadd.f32 1.1283791, %v2390_v12 }
 0x783   : > { %v2366_v32 = vmul.f32 %v3824_v53, %v2365_v15  ;;  %vm2413_vm5 = vcmp.eq.f32.partialorder %v2412_v13, 8.507059e+37  ;;  %vm2448_vm6 = vweird.f32 %v5039_v28  ;;  %v2415_v35 = vor.u32 1.1754944e-38, %v2414_v21 }
 0x784   : > { %v3826_v43 = vpop.eup %3825  ;;  %v2482_v7 = vadd.f32 1.0, %v2481_v20  ;;  %v2455_v23 = vor.u32 1.1754944e-38, %v2454_v27  ;;  %vm2453_vm8 = vcmp.eq.f32.partialorder %v2452_v25, 8.507059e+37  ;;  %v2392_v40 = vmul.f32 %v2391_v3, %v4967_v63 }
 0x785   : > { %v2367_v46 = vadd.f32 %v3824_v53, %v2366_v32  ;;  %v2404_v59 = vmul.f32 %v3826_v43, %v5031_v16  ;;  %vm2409_vm2 = vweird.f32 %v3826_v43  ;;  %v2470_v32 = vmul.f32 %v2469_v8, %v5002_v29 }
 0x786   : > { %3829 = vrcp.f32 %v2482_v7  ;;  %vm5065_vm4 = vmor %vm2408_vm1, %vm2409_vm2  ;;  %v2432_v16 = vmul.f32 %v2431_v57, %v4973_v62  ;;  %v2492_v55 = vand.u32 2147483647, %v2482_v7  ;;  %v2324_v29 = vmul.f32 0.5, %v4946_v47 }
 0x787   : > { %v2405_v48 = vsub.f32 1.0, %v2404_v59  ;;  %v2371_v1 = vsel %vm2370_vm15, %v3824_v53, %v2367_v46  ;;  %v3828_v6 = vpop.eup %3827  ;;  %v2494_v59 = vand.u32 2147483648, %v2482_v7  ;;  %v2326_v62 = vmul.f32 0.5, %v4964_v58 }
 0x788   : > { %v2376_v10 = vsel %vm2373_vm0, %v2375_v4, %v2371_v1  ;;  %v2444_v41 = vmul.f32 %v3828_v6, %v5039_v28  ;;  %vm2449_vm3 = vweird.f32 %v3828_v6  ;;  %v2471_v28 = vadd.f32 1.1283791, %v2470_v32 }
 0x789   : > { %v2406_v17 = vmul.f32 %v3826_v43, %v2405_v48  ;;  %v2377_v18 = vmul.f32 %v2376_v10, %v2352_v11  ;;  %vm2450_vm7 = vmor %vm2448_vm6, %vm2449_vm3  ;;  %vm2488_vm10 = vweird.f32 %v2482_v7  ;;  %v2495_v1 = vor.u32 1.1754944e-38, %v2494_v59 }
 0x78a   : > { %v2445_v53 = vsub.f32 1.0, %v2444_v41  ;;  %v2472_v63 = vmul.f32 %v2471_v28, %v4991_v24  ;;  %vm2493_vm12 = vcmp.eq.f32.partialorder %v2492_v55, 8.507059e+37  ;;  %v2325_v47 = vmul.f32 0.5, %v4958_v52 }
 0x78b   : > { %v2407_v44 = vadd.f32 %v3826_v43, %v2406_v17  ;;  %v3348_v14 = vclamps-f32 %v2377_v18, 1.0  ;;  %v2327_v58 = vmul.f32 0.5, %v4982_v5 }
 0x78c   : > { %v2446_v22 = vmul.f32 %v3828_v6, %v2445_v53  ;;  %v3830_v15 = vpop.eup %3829 }
 0x78d   : > { %v2411_v9 = vsel %vm5065_vm4, %v3826_v43, %v2407_v44  ;;  %v2484_v36 = vmul.f32 %v3830_v15, %v2482_v7  ;;  %v2660_v50 = vadd.f32 1.0, %v3348_v14  ;;  %vm2489_vm9 = vweird.f32 %v3830_v15 }
 0x78e   : > { %v2447_v39 = vadd.f32 %v3828_v6, %v2446_v22  ;;  %v2416_v37 = vsel %vm2413_vm5, %v2415_v35, %v2411_v9  ;;  %vm2490_vm11 = vmor %vm2488_vm10, %vm2489_vm9 }
 0x78f   : > { %v2485_v46 = vsub.f32 1.0, %v2484_v36  ;;  %v2417_v38 = vmul.f32 %v2416_v37, %v2392_v40  ;;  %v2668_v0 = vmul.f32 %v2660_v50, %v2324_v29 }
 0x790   : > { %v2451_v33 = vsel %vm2450_vm7, %v3828_v6, %v2447_v39 }
 0x791   : > { %v2456_v42 = vsel %vm2453_vm8, %v2455_v23, %v2451_v33  ;;  %v2486_v60 = vmul.f32 %v3830_v15, %v2485_v46  ;;  %v3349_v2 = vclamps-f32 %v2417_v38, 1.0 }
 0x792   : > { %v2457_v43 = vmul.f32 %v2456_v42, %v2432_v16 }
 0x793   : > { %v2487_v61 = vadd.f32 %v3830_v15, %v2486_v60  ;;  %v2661_v10 = vadd.f32 1.0, %v3349_v2 }
 0x794   : > { %v3350_v51 = vclamps-f32 %v2457_v43, 1.0 }
 0x795   : > { %v2491_v4 = vsel %vm2490_vm11, %v3830_v15, %v2487_v61  ;;  %v2669_v41 = vmul.f32 %v2661_v10, %v2325_v47 }
 0x796   : > { %v2662_v48 = vadd.f32 1.0, %v3350_v51  ;;  %v2496_v17 = vsel %vm2493_vm12, %v2495_v1, %v2491_v4 }
 0x797   : > { %v2497_v49 = vmul.f32 %v2496_v17, %v2472_v63 }
 0x798   : > { %v2670_v20 = vmul.f32 %v2662_v48, %v2326_v62 }
 0x799   : > { %v3351_v56 = vclamps-f32 %v2497_v49, 1.0 }
 0x79a   : > { %v2676_v6 = vpack.c.bf16 %v2670_v20, %v2668_v0 }
 0x79b   : > { %v2663_v7 = vadd.f32 1.0, %v3351_v56 }
 0x79c   : > { %2820 = vmatmul.bf16.vlgmr.msrb.gmra.mxu3 %v2676_v6 }
 0x79d   : > { %v2671_v11 = vmul.f32 %v2663_v7, %v2327_v58 }
 0x79f   : > { %v2677_v24 = vpack.c.bf16 %v2671_v11, %v2669_v41 }
 0x7a1   : > { %2839 = vmatmul.bf16.vlgmr.msra.gmra.mxu0 %v2677_v24 }
 0x7ac   : > { %v2300_v12 = vpop.f32.mrf.mxu1 }
 0x7ad   : > { %v5081_v44 = vadd.f32 %v2300_v12, %v4943_v31 }
 0x7af   : > { %v5084_v13 = vmul.f32 0.70710677, %v5081_v44 }
 0x7b1   : > { %v2500_v53 = vmul.f32 %v5084_v13, %v5084_v13 }
 0x7b2   : > { %v2319_v18 = vpop.f32.mrf.mxu2 }
 0x7b3   : > { %v5088_v21 = vmin.f32 %v2500_v53, 16.0  ;;  %v5091_v52 = vadd.f32 %v2319_v18, %v4951_v54 }
 0x7b4   : > { %v2302_v5 = vpop.f32.mrf.mxu1 }
 0x7b5   : > { %v2502_v27 = vmul.f32 2.1237322e-06, %v5088_v21  ;;  %v5095_v8 = vmul.f32 0.70710677, %v5091_v52  ;;  %v5098_v57 = vadd.f32 %v2302_v5, %v4943_v31  ;;  %v2513_v22 = vmul.f32 3.8918573e-05, %v5088_v21 }
 0x7b7   : > { %v2503_v25 = vadd.f32 0.00028619796, %v2502_v27  ;;  %v2540_v3 = vmul.f32 %v5095_v8, %v5095_v8  ;;  %v5104_v26 = vmul.f32 0.70710677, %v5098_v57  ;;  %v2514_v9 = vadd.f32 0.001143296, %v2513_v22 }
 0x7b9   : > { %v2504_v39 = vmul.f32 %v2503_v25, %v5088_v21  ;;  %v5107_v15 = vmin.f32 %v2540_v3, 16.0  ;;  %v2580_v14 = vmul.f32 %v5104_v26, %v5104_v26  ;;  %v2515_v31 = vmul.f32 %v2514_v9, %v5088_v21 }
 0x7ba   : > { %v2321_v35 = vpop.f32.mrf.mxu2 }
 0x7bb   : > { %v2542_v23 = vmul.f32 2.1237322e-06, %v5107_v15  ;;  %v5113_v32 = vmin.f32 %v2580_v14, 16.0  ;;  %v5116_v16 = vadd.f32 %v2321_v35, %v4951_v54  ;;  %v2516_v33 = vadd.f32 0.014752088, %v2515_v31 }
 0x7bc   : > { %v2553_v36 = vmul.f32 3.8918573e-05, %v5107_v15  ;;  %v2505_v37 = vadd.f32 0.0036580483, %v2504_v39 }
 0x7bd   : > { %v2582_v42 = vmul.f32 2.1237322e-06, %v5113_v32  ;;  %v5121_v40 = vmul.f32 0.70710677, %v5116_v16  ;;  %v2517_v43 = vmul.f32 %v2516_v33, %v5088_v21  ;;  %v2593_v46 = vmul.f32 3.8918573e-05, %v5113_v32 }
 0x7be   : > { %v2554_v50 = vadd.f32 0.001143296, %v2553_v36  ;;  %v2543_v28 = vadd.f32 0.00028619796, %v2542_v23  ;;  %v2506_v60 = vmul.f32 %v2505_v37, %v5088_v21 }
 0x7bf   : > { %v2583_v55 = vadd.f32 0.00028619796, %v2582_v42  ;;  %v2620_v54 = vmul.f32 %v5121_v40, %v5121_v40  ;;  %v2518_v59 = vadd.f32 0.112945676, %v2517_v43  ;;  %v2594_v38 = vadd.f32 0.001143296, %v2593_v46 }
 0x7c0   : > { %v2555_v51 = vmul.f32 %v2554_v50, %v5107_v15  ;;  %v2544_v63 = vmul.f32 %v2543_v28, %v5107_v15  ;;  %v2507_v49 = vadd.f32 0.05243302, %v2506_v60 }
 0x7c1   : > { %v2584_v29 = vmul.f32 %v2583_v55, %v5113_v32  ;;  %v5130_v62 = vmin.f32 %v2620_v54, 16.0  ;;  %v2519_v48 = vmul.f32 %v2518_v59, %v5088_v21  ;;  %v2595_v61 = vmul.f32 %v2594_v38, %v5113_v32 }
 0x7c2   : > { %v2556_v0 = vadd.f32 0.014752088, %v2555_v51  ;;  %v2545_v58 = vadd.f32 0.0036580483, %v2544_v63  ;;  %v2508_v5 = vmul.f32 %v2507_v49, %v5088_v21 }
 0x7c3   : > { %v2585_v1 = vadd.f32 0.0036580483, %v2584_v29  ;;  %v2622_v2 = vmul.f32 2.1237322e-06, %v5130_v62  ;;  %v2520_v20 = vadd.f32 0.4994258, %v2519_v48 }
 0x7c4   : > { %v2596_v4 = vadd.f32 0.014752088, %v2595_v61  ;;  %v2557_v17 = vmul.f32 %v2556_v0, %v5107_v15  ;;  %v2633_v6 = vmul.f32 3.8918573e-05, %v5130_v62  ;;  %v2546_v25 = vmul.f32 %v2545_v58, %v5107_v15 }
 0x7c5   : > { %v2521_v10 = vmul.f32 %v2520_v20, %v5088_v21  ;;  %v2623_v7 = vadd.f32 0.00028619796, %v2622_v2  ;;  %v2586_v11 = vmul.f32 %v2585_v1, %v5113_v32  ;;  %v2509_v37 = vadd.f32 0.18741608, %v2508_v5 }
 0x7c6   : > { %v2597_v56 = vmul.f32 %v2596_v4, %v5113_v32  ;;  %v2558_v47 = vadd.f32 0.112945676, %v2557_v17  ;;  %v2634_v41 = vadd.f32 0.001143296, %v2633_v6  ;;  %v2547_v42 = vadd.f32 0.05243302, %v2546_v25 }
 0x7c7   : > { %v2522_v24 = vadd.f32 1.0, %v2521_v10  ;;  %v2624_v27 = vmul.f32 %v2623_v7, %v5130_v62  ;;  %v2587_v3 = vadd.f32 0.05243302, %v2586_v11  ;;  %v2510_v38 = vmul.f32 %v2509_v37, %v5088_v21 }
 0x7c8   : > { %v2598_v12 = vadd.f32 0.112945676, %v2597_v56  ;;  %v2559_v53 = vmul.f32 %v2558_v47, %v5107_v15  ;;  %v2635_v18 = vmul.f32 %v2634_v41, %v5130_v62  ;;  %v2548_v51 = vmul.f32 %v2547_v42, %v5107_v15 }
 0x7c9   : > { %3831 = vrcp.f32 %v2522_v24  ;;  %v2625_v23 = vadd.f32 0.0036580483, %v2624_v27  ;;  %v2588_v43 = vmul.f32 %v2587_v3, %v5113_v32  ;;  %v2534_v48 = vand.u32 2147483648, %v2522_v24 }
 0x7ca   : > { %v2599_v22 = vmul.f32 %v2598_v12, %v5113_v32  ;;  %v2560_v9 = vadd.f32 0.4994258, %v2559_v53  ;;  %v2636_v39 = vadd.f32 0.014752088, %v2635_v18  ;;  %v2532_v0 = vand.u32 2147483647, %v2522_v24 }
 0x7cb   : > { %v2626_v54 = vmul.f32 %v2625_v23, %v5130_v62  ;;  %v2589_v60 = vadd.f32 0.18741608, %v2588_v43  ;;  %vm2528_vm14 = vweird.f32 %v2522_v24  ;;  %v2511_v4 = vadd.f32 1.1283791, %v2510_v38 }
 0x7cc   : > { %v2600_v14 = vadd.f32 0.4994258, %v2599_v22  ;;  %v2561_v35 = vmul.f32 %v2560_v9, %v5107_v15  ;;  %v2637_v31 = vmul.f32 %v2636_v39, %v5130_v62  ;;  %v2549_v17 = vadd.f32 0.18741608, %v2548_v51 }
 0x7cd   : > { %v2627_v63 = vadd.f32 0.05243302, %v2626_v54  ;;  %v2590_v6 = vmul.f32 %v2589_v60, %v5113_v32  ;;  %v2535_v10 = vor.u32 1.1754944e-38, %v2534_v48  ;;  %vm2533_vm0 = vcmp.eq.f32.partialorder %v2532_v0, 8.507059e+37 }
 0x7ce   : > { %v2601_v33 = vmul.f32 %v2600_v14, %v5113_v32  ;;  %v5151_v46 = vadd.f32 1.0, %v2561_v35  ;;  %v2638_v55 = vadd.f32 0.112945676, %v2637_v31  ;;  %v2512_v12 = vmul.f32 %v2511_v4, %v5084_v13 }
 0x7cf   : > { %v3832_v36 = vpop.eup %3831  ;;  %v2628_v7 = vmul.f32 %v2627_v63, %v5130_v62  ;;  %v2550_v53 = vmul.f32 %v2549_v17, %v5107_v15  ;;  %v2591_v32 = vadd.f32 1.1283791, %v2590_v6  ;;  %v2330_v48 = vmul.f32 0.5, %v5098_v57 }
 0x7d0   : > { %v2524_v50 = vmul.f32 %v3832_v36, %v2522_v24  ;;  %v2602_v28 = vadd.f32 1.0, %v2601_v33  ;;  %3833 = vrcp.f32 %v5151_v46  ;;  %vm2529_vm13 = vweird.f32 %v3832_v36 }
 0x7d1   : > { %v2639_v61 = vmul.f32 %v2638_v55, %v5130_v62  ;;  %vm2530_vm15 = vmor %vm2528_vm14, %vm2529_vm13  ;;  %v2629_v9 = vadd.f32 0.18741608, %v2628_v7  ;;  %vm2568_vm3 = vweird.f32 %v5151_v46  ;;  %v2574_v14 = vand.u32 2147483648, %v5151_v46 }
 0x7d2   : > { %v2525_v59 = vsub.f32 1.0, %v2524_v50  ;;  %3835 = vrcp.f32 %v2602_v28  ;;  %v2614_v5 = vand.u32 2147483648, %v2602_v28  ;;  %v2612_v3 = vand.u32 2147483647, %v2602_v28 }
 0x7d3   : > { %v2640_v2 = vadd.f32 0.4994258, %v2639_v61  ;;  %vm2608_vm4 = vweird.f32 %v2602_v28  ;;  %v2572_v15 = vand.u32 2147483647, %v5151_v46  ;;  %v2551_v31 = vadd.f32 1.1283791, %v2550_v53 }
 0x7d4   : > { %v2526_v29 = vmul.f32 %v3832_v36, %v2525_v59  ;;  %v2592_v23 = vmul.f32 %v2591_v32, %v5104_v26  ;;  %v2615_v33 = vor.u32 1.1754944e-38, %v2614_v5  ;;  %vm2613_vm7 = vcmp.eq.f32.partialorder %v2612_v3, 8.507059e+37 }
 0x7d5   : > { %v2641_v47 = vmul.f32 %v2640_v2, %v5130_v62  ;;  %v2630_v50 = vmul.f32 %v2629_v9, %v5130_v62  ;;  %v2575_v55 = vor.u32 1.1754944e-38, %v2574_v14  ;;  %vm2573_vm8 = vcmp.eq.f32.partialorder %v2572_v15, 8.507059e+37 }
 0x7d6   : > { %v2527_v1 = vadd.f32 %v3832_v36, %v2526_v29  ;;  %v3834_v20 = vpop.eup %3833  ;;  %v2552_v26 = vmul.f32 %v2551_v31, %v5095_v8  ;;  %v2331_v7 = vmul.f32 0.5, %v5116_v16 }
 0x7d7   : > { %v2564_v56 = vmul.f32 %v3834_v20, %v5151_v46  ;;  %v2642_v24 = vadd.f32 1.0, %v2641_v47  ;;  %vm2569_vm1 = vweird.f32 %v3834_v20  ;;  %v2328_v46 = vmul.f32 0.5, %v5081_v44 }
 0x7d8   : > { %v3836_v21 = vpop.eup %3835  ;;  %v2531_v49 = vsel %vm2530_vm15, %v3832_v36, %v2527_v1  ;;  %vm5166_vm5 = vmor %vm2568_vm3, %vm2569_vm1  ;;  %v2631_v61 = vadd.f32 1.1283791, %v2630_v50 }
 0x7d9   : > { %v2604_v58 = vmul.f32 %v3836_v21, %v2602_v28  ;;  %v2536_v41 = vsel %vm2533_vm0, %v2535_v10, %v2531_v49  ;;  %v2565_v11 = vsub.f32 1.0, %v2564_v56  ;;  %3837 = vrcp.f32 %v2642_v24 }
 0x7da   : > { %v2537_v22 = vmul.f32 %v2536_v41, %v2512_v12  ;;  %vm2609_vm2 = vweird.f32 %v3836_v21  ;;  %v2652_v0 = vand.u32 2147483647, %v2642_v24  ;;  %v2654_v63 = vand.u32 2147483648, %v2642_v24  ;;  %v3740_v12 = vld [vmem:[%s764_s17] ss:$0 sm:$0xff] }
 0x7db   : > { %v2605_v18 = vsub.f32 1.0, %v2604_v58  ;;  %v2566_v27 = vmul.f32 %v3834_v20, %v2565_v11  ;;  %vm2610_vm6 = vmor %vm2608_vm4, %vm2609_vm2  ;;  %vm2648_vm10 = vweird.f32 %v2642_v24  ;;  %v2632_v44 = vmul.f32 %v2631_v61, %v5121_v40 }
 0x7dc   : > { %v3352_v36 = vclamps-f32 %v2537_v22, 1.0  ;;  %v2655_v8 = vor.u32 1.1754944e-38, %v2654_v63  ;;  %vm2653_vm12 = vcmp.eq.f32.partialorder %v2652_v0, 8.507059e+37  ;;  %v2329_v58 = vmul.f32 0.5, %v5091_v52 }
 0x7dd   : > { %v2606_v25 = vmul.f32 %v3836_v21, %v2605_v18  ;;  %v2567_v39 = vadd.f32 %v3834_v20, %v2566_v27 }
 0x7de   : > { %v2664_v60 = vadd.f32 1.0, %v3352_v36 }
 0x7df   : > { %v2607_v35 = vadd.f32 %v3836_v21, %v2606_v25  ;;  %v2571_v42 = vsel %vm5166_vm5, %v3834_v20, %v2567_v39  ;;  %v3838_v43 = vpop.eup %3837 }
 0x7e0   : > { %v2644_v59 = vmul.f32 %v3838_v43, %v2642_v24  ;;  %v2576_v38 = vsel %vm2573_vm8, %v2575_v55, %v2571_v42  ;;  %vm2649_vm9 = vweird.f32 %v3838_v43  ;;  %v2672_v20 = vmul.f32 %v2664_v60, %v2328_v46 }
 0x7e1   : > { %v2611_v37 = vsel %vm2610_vm6, %v3836_v21, %v2607_v35  ;;  %v2577_v62 = vmul.f32 %v2576_v38, %v2552_v26  ;;  %vm2650_vm11 = vmor %vm2648_vm10, %vm2649_vm9 }
 0x7e2   : > { %v2616_v28 = vsel %vm2613_vm7, %v2615_v33, %v2611_v37  ;;  %v2645_v29 = vsub.f32 1.0, %v2644_v59 }
 0x7e3   : > { %v2617_v54 = vmul.f32 %v2616_v28, %v2592_v23  ;;  %v3353_v21 = vclamps-f32 %v2577_v62, 1.0 }
 0x7e4   : > { %v2646_v2 = vmul.f32 %v3838_v43, %v2645_v29 }
 0x7e5   : > { %v3354_v51 = vclamps-f32 %v2617_v54, 1.0  ;;  %v2665_v47 = vadd.f32 1.0, %v3353_v21 }
 0x7e6   : > { %v2647_v17 = vadd.f32 %v3838_v43, %v2646_v2 }
 0x7e7   : > { %v2666_v1 = vadd.f32 1.0, %v3354_v51  ;;  %v2673_v11 = vmul.f32 %v2665_v47, %v2329_v58 }
 0x7e8   : > { %v2651_v49 = vsel %vm2650_vm11, %v3838_v43, %v2647_v17 }
 0x7e9   : > { %v2674_v4 = vmul.f32 %v2666_v1, %v2330_v48  ;;  %v2656_v57 = vsel %vm2653_vm12, %v2655_v8, %v2651_v49 }
 0x7ea   : > { %v2657_v10 = vmul.f32 %v2656_v57, %v2632_v44 }
 0x7eb   : > { %v2678_v6 = vpack.c.bf16 %v2674_v4, %v2672_v20 }
 0x7ec   : > { %v3355_v56 = vclamps-f32 %v2657_v10, 1.0 }
 0x7ed   : > { %2825 = vmatmul.bf16.gmra.mxu3 %v2678_v6 }
 0x7ee   : > { %v2667_v41 = vadd.f32 1.0, %v3355_v56 }
 0x7f0   : > { %v2675_v24 = vmul.f32 %v2667_v41, %v2331_v7 }
 0x7f2   : > { %v2679_v40 = vpack.c.bf16 %v2675_v24, %v2673_v11 }
 0x7f4   : > { %2844 = vmatmul.bf16.gmra.mxu0 %v2679_v40 }
 0x81e   : > { %v2840_v18 = vpop.f32.mrf.mxu0 }
 0x81f   : > { %v2821_v53 = vpop.f32.mrf.mxu3 }
 0x820   : > { %v2822_v32 = vadd.f32 %v3740_v12, %v2821_v53 }
 0x822   : > { %v2841_v5 = vadd.f32 %v2840_v18, %v2822_v32 }
 0x824   : > { %v2850_v27 = vadd.f32 %v2841_v5, %v4862_v45 }
 0x826   : > { %2854 = vst [vmem:[#allocation2 + $0x10] sm:$0xff] %v2850_v27  ;;  %v2842_v16 = vpop.f32.mrf.mxu0 }
 0x827   : > { %v2823_v52 = vpop.f32.mrf.mxu3 }
 0x828   : > { %v2824_v22 = vadd.f32 %v3740_v12, %v2823_v52 }
 0x82a   : > { %v2843_v25 = vadd.f32 %v2842_v16, %v2824_v22 }
 0x82c   : > { %v2851_v3 = vadd.f32 %v2843_v25, %v4865_v30 }
 0x82e   : > { %2855 = vst [vmem:[#allocation2] sm:$0xff] %v2851_v3 }
 0x870   : > { %v2826_v9 = vpop.f32.mrf.mxu3 }
 0x871   : > { %v2827_v39 = vadd.f32 %v3740_v12, %v2826_v9  ;;  %v2845_v14 = vpop.f32.mrf.mxu0 }
 0x873   : > { %v2846_v35 = vadd.f32 %v2845_v14, %v2827_v39 }
 0x875   : > { %v2852_v13 = vadd.f32 %v2846_v35, %v4868_v19 }
 0x877   : > { %2856 = vst [vmem:[#allocation2 + $0x18] sm:$0xff] %v2852_v13 }
 0x878   : > { %v2828_v15 = vpop.f32.mrf.mxu3 }
 0x879   : > { %v2829_v31 = vadd.f32 %v3740_v12, %v2828_v15  ;;  %v2847_v23 = vpop.f32.mrf.mxu0 }
 0x87b   : > { %v2848_v33 = vadd.f32 %v2847_v23, %v2829_v31  ;;  %2861 = sbr.rel (%p3420_p3) target bundleno = 2180 (0x884), region = 112 }
 0x87d   : > { %v2853_v45 = vadd.f32 %v2848_v33, %v4871_v34 }
 0x87f   : > { %2857 = vst [vmem:[#allocation2 + $0x8] sm:$0xff] %v2853_v45 }
 0x880   : > { %2862 = vst [vmem:[#allocation18] sm:$0xff] %v2850_v27 }
 0x881   : > { %2863 = vst [vmem:[#allocation18 + $0x8] sm:$0xff] %v2851_v3 }
 0x882   : > { %2864 = vst [vmem:[#allocation18 + $0x10] sm:$0xff] %v2852_v13 }
 0x883   : > { %2865 = vst [vmem:[#allocation18 + $0x18] sm:$0xff] %v2853_v45 }
 0x884 PF: > { %p3551_p4 = scmp.eq.s32.totalorder %s4402_s18, 1  ;;  %s5266_s21 = sld [smem:[#allocation36_spill]] }
 0x885   : > { %s4224_s6 = smov [#allocation18]   ;;  %s4225_s20 = smov 128  }
 0x886   : > { %s2875_s8 = sshll.u32 %s4224_s6, 4  ;;  %s4226_s13 = smov 8   ;;  %s2876_s8 = int_to_ptr.vmem [resolvable:$true] %s2875_s8 }
 0x88a   : > { %s2877_s11 = sshll.u32 %s5266_s21, 4  ;;  %s2878_s11 = int_to_ptr.hbm [resolvable:$true] %s2877_s11 }
 0x88b   : > { %3516 = dma.vmem_to_hbm [thread:$0]  (%p3551_p4), %s2876_s8, 512, %s2878_s11, [#allocation5], %s4225_s20, %s4225_s20, %s4226_s13  }
 0x88c   : > { %4186 = dma.done.wait (%p3551_p4), [#allocation5], 512  }
 0x88d   : > { %4188 = vsyncadd (%p3551_p4), [#allocation5], 4294966784 }
 0x88e PF: > { %s36_s26 = sadd.s32 1, %s4211_s26   ;;  %s5267_s24 = sld [smem:[#allocation25_spill]] }
 0x88f   : > { %p33_p5 = scmp.ge.s32.totalorder %s36_s26, 4   ;;  %s5268_s23 = sld [smem:[#allocation27_spill]] }
 0x890   : > { %s5269_s18 = sld [smem:[#allocation26_spill]]  ;;  %s5270_s21 = smov %s4195_s22 }
 0x892   :  { %35 = sbr.rel (!%p33_p5) target bundleno = 22 (0x16), region = 212 }
 0x894   : > { %s5271_s22 = smov %s5267_s24  ;;  %s5272_s24 = smov %s4207_s25 }
 0x896   : > { %s5273_s25 = smov %s5269_s18 }
 0x897   :  { %2894 = vsyncpa [#allocation4], 1 }
 0x898   :  { %2896 = vsyncpa [#allocation4 + $0x1], 1 }
 0x899   :  { %2897 = vsyncpa [#allocation7], 1 }
 0x89a   :  { %2899 = vsyncpa [#allocation7 + $0x1], 1 }
 0x89b   :  { %2900 = vsyncpa [#allocation10], 1 }
 0x89c   :  { %2902 = vsyncpa [#allocation10 + $0x1], 1 }
 0x89d   :  { %2903 = vsyncpa [#allocation13], 1 }
 0x89e   :  { %2905 = vsyncpa [#allocation13 + $0x1], 1 }
 0x89f   :  { %2906 = vsyncpa [#allocation16], 1 }
 0x8a0   :  { %2908 = vsyncpa [#allocation16 + $0x1], 1 }
 0x8a1   :  { %2909 = vsyncpa [#allocation5], 1 }
 0x8a2   :  { %2911 = vsyncpa [#allocation5 + $0x1], 1 }

</bundles_post_ra>
